<compile_context>
chip_gen: v6e
topology: v6e:2x2x1
jax: 0.10.0
libtpu: 0.0.40
codegen_flags: <defaults>
</compile_context>

<pallas_src>
import functools

import jax
import jax.numpy as jnp
from jax import lax
from jax.experimental import pallas as pl
from jax.experimental.pallas import tpu as pltpu

MODEL_DIM = 180
N_HEAD = 4
HEAD_DIM = MODEL_DIM // N_HEAD          # 45 (true PyTorch head dim; softmax scale uses this)
DH_PAD = 128                            # lane-aligned padded head dim (Q/K only)
FFN_DIM = 4 * MODEL_DIM                 # 720
LN_EPS = 1e-5
SELU_ALPHA = 1.6732632423543772
SELU_SCALE = 1.0507009873554805

# Row layout of the packed per-layer vector slab (VEC_ROWS x VEC_LANES, f32).
VEC_LANES = 2 * N_HEAD * DH_PAD         # 1024
VEC_ROWS = 12
ROW_BQK = 0                             # fused/padded Q,K bias (1024)
ROW_BVO0 = 1                            # rows 1..4: folded per-head V*Wo bias (E)
ROW_BO = 5                              # attention out-proj bias (E)
ROW_LN1W, ROW_LN1B = 6, 7
ROW_B1 = 8                              # FFN linear1 bias (FFN_DIM)
ROW_B2 = 9                              # FFN linear2 bias (E)
ROW_LN2W, ROW_LN2B = 10, 11


def _layer_norm(x, w, b):
    # x: (S, E) f32, w/b: (1, E) f32.  E is the true model dim (no padding), so mean/var are exact.
    mu = jnp.mean(x, axis=-1, keepdims=True)
    var = jnp.mean((x - mu) ** 2, axis=-1, keepdims=True)
    return (x - mu) * lax.rsqrt(var + LN_EPS) * w + b


def long_time_regression_kernel(
    x_ref, pos_ref,
    wqk_ref, wvo_ref, w1_ref, w2_ref, vec_ref,
    fcw_ref, fcb_ref,
    o_ref,
    x_carry, mask_sc,
    *, num_heads, head_dim, head_dim_pad,
):
    l = pl.program_id(0)
    num_layers = pl.num_programs(0)
    S, E = x_ref.shape

    # First layer iteration: F = x + position_encoder[:S] and build the causal additive mask once.
    @pl.when(l == 0)
    def _():
        x_carry[...] = x_ref[...] + pos_ref[...]
        row = lax.broadcasted_iota(jnp.int32, (S, S), 0)
        col = lax.broadcasted_iota(jnp.int32, (S, S), 1)
        mask_sc[...] = jnp.where(col <= row, 0.0, -1e30).astype(jnp.float32)

    x = x_carry[...]                                            # (S, E) f32
    x_bf = x.astype(jnp.bfloat16)
    mask = mask_sc[...]                                         # (S, S) f32, reused across heads
    scale = jnp.float32(1.0 / (head_dim ** 0.5))                # 1/sqrt(45), true head dim

    def vrow(r, n):                                             # (1, n) f32 slice of packed vectors
        return vec_ref[0, r:r + 1, :n]

    # ---- fused Q/K projection: one MXU matmul; per-head 128-lane blocks [q_h | k_h] ----
    qk = jnp.dot(x_bf, wqk_ref[0], preferred_element_type=jnp.float32)
    qk = (qk + vrow(ROW_BQK, 2 * num_heads * head_dim_pad)).astype(jnp.bfloat16)

    # ---- per-head attention with folded V*Wo projection, accumulated into attn ----
    attn = jnp.zeros((S, E), jnp.float32)
    for h in range(num_heads):
        base = h * 2 * head_dim_pad                             # lane-aligned offsets
        q = qk[:, base:base + head_dim_pad]                     # (S, 128) bf16
        k = qk[:, base + head_dim_pad:base + 2 * head_dim_pad]  # (S, 128) bf16
        # q @ k^T without an explicit transpose (contract last dims on the MXU).
        s = lax.dot_general(q, k, dimension_numbers=(((1,), (1,)), ((), ())),
                            preferred_element_type=jnp.float32)
        s = s * scale + mask
        s = s - jnp.max(s, axis=-1, keepdims=True)
        p = jnp.exp(s)
        p = p * pl.reciprocal(jnp.sum(p, axis=-1, keepdims=True), approx=True)
        # vo_h = x @ (Wv_h^T Wo_h^T) + (bv_h Wo_h^T)   -- exact fold of V and out-projection.
        vo = jnp.dot(x_bf, wvo_ref[0, h], preferred_element_type=jnp.float32)
        vo = vo + vrow(ROW_BVO0 + h, E)
        attn = attn + jnp.dot(p.astype(jnp.bfloat16), vo.astype(jnp.bfloat16),
                              preferred_element_type=jnp.float32)
    attn = attn + vrow(ROW_BO, E)

    x = _layer_norm(x + attn, vrow(ROW_LN1W, E), vrow(ROW_LN1B, E))

    # ---- feed-forward (ReLU) ----
    ff = jnp.dot(x.astype(jnp.bfloat16), w1_ref[0], preferred_element_type=jnp.float32)
    ff = jnp.maximum(ff + vrow(ROW_B1, FFN_DIM), 0.0)
    ff = jnp.dot(ff.astype(jnp.bfloat16), w2_ref[0], preferred_element_type=jnp.float32)
    ff = ff + vrow(ROW_B2, E)

    x = _layer_norm(x + ff, vrow(ROW_LN2W, E), vrow(ROW_LN2B, E))
    x_carry[...] = x

    # ---- head: O = SELU(FC(C)) + C   (only after the last layer) ----
    @pl.when(l == num_layers - 1)
    def _():
        fc = jnp.dot(x.astype(jnp.bfloat16), fcw_ref[...],
                     preferred_element_type=jnp.float32) + fcb_ref[...]
        selu = SELU_SCALE * jnp.where(fc > 0.0, fc, SELU_ALPHA * (jnp.exp(fc) - 1.0))
        o_ref[...] = (selu + x).astype(o_ref.dtype)


def init_torch_params(key, padding, num_layers, model_dim=MODEL_DIM):
    """Deterministic synthetic parameters in PyTorch layout (weights (out,in), 1-D biases)."""
    E, F, L = model_dim, 4 * model_dim, num_layers
    std = 0.05
    keys = jax.random.split(key, L + 3)

    def nrm(k, shape, s=std):
        return (s * jax.random.normal(k, shape)).astype(jnp.float32)

    layers = []
    for l in range(L):
        k = jax.random.split(keys[l], 8)
        layers.append(dict(
            in_proj_weight=nrm(k[0], (3 * E, E)),
            in_proj_bias=nrm(k[1], (3 * E,), 0.01),
            out_proj_weight=nrm(k[2], (E, E)),
            out_proj_bias=nrm(k[3], (E,), 0.01),
            ln1_weight=jnp.ones((E,), jnp.float32),
            ln1_bias=jnp.zeros((E,), jnp.float32),
            linear1_weight=nrm(k[4], (F, E)),
            linear1_bias=nrm(k[5], (F,), 0.01),
            linear2_weight=nrm(k[6], (E, F)),
            linear2_bias=nrm(k[7], (E,), 0.01),
            ln2_weight=jnp.ones((E,), jnp.float32),
            ln2_bias=jnp.zeros((E,), jnp.float32),
        ))
    return dict(
        pos=jax.random.normal(keys[-3], (padding, E)).astype(jnp.float32),
        layers=layers,
        fc_weight=nrm(keys[-2], (E, E)),
        fc_bias=nrm(keys[-1], (E,), 0.01),
    )


def prepare_params(tp, num_heads=N_HEAD):
    """PyTorch layout -> kernel layout.

    * Q/K rows of in_proj_weight per head, transposed to (in,out), zero-padded 45->128 columns,
      fused into one (E, H*2*128) QK weight per layer (lane-aligned per-head slices in kernel).
    * V and the out-projection are folded offline:  W_vo_h = Wv_h^T @ Wo_h^T  (E,E) per head,
      b_vo_h = bv_h @ Wo_h^T.  Stored as (L, H, E, E) so the kernel slices the ref per head.
    * All per-layer vectors packed into one (L, 12, 1024) f32 slab (single streamed DMA).
    * MXU weights cast to bf16; vectors stay f32.
    """
    E, dh, dhp, F = MODEL_DIM, HEAD_DIM, DH_PAD, FFN_DIM

    wqk_l, wvo_l, w1_l, w2_l, vec_l = [], [], [], [], []
    for lp in tp["layers"]:
        in_w, in_b = lp["in_proj_weight"], lp["in_proj_bias"]   # rows ordered [q|k|v] in PyTorch
        out_wt = jnp.transpose(lp["out_proj_weight"])           # (E_in=concat, E_out)

        qk_cols, bqk_cols, wvo_h, bvo_h = [], [], [], []
        for h in range(num_heads):
            wq = jnp.transpose(in_w[h * dh:(h + 1) * dh, :])                # (E, dh)
            wk = jnp.transpose(in_w[E + h * dh:E + (h + 1) * dh, :])        # (E, dh)
            wv = jnp.transpose(in_w[2 * E + h * dh:2 * E + (h + 1) * dh, :])  # (E, dh)
            bq = in_b[h * dh:(h + 1) * dh]
            bk = in_b[E + h * dh:E + (h + 1) * dh]
            bv = in_b[2 * E + h * dh:2 * E + (h + 1) * dh]
            wo_h = out_wt[h * dh:(h + 1) * dh, :]                           # (dh, E)

            qk_cols += [jnp.pad(wq, ((0, 0), (0, dhp - dh))),
                        jnp.pad(wk, ((0, 0), (0, dhp - dh)))]
            bqk_cols += [jnp.pad(bq, (0, dhp - dh)), jnp.pad(bk, (0, dhp - dh))]
            wvo_h.append(wv @ wo_h)                                         # (E, E) folded in f32
            bvo_h.append(bv @ wo_h)                                         # (E,)

        wqk_l.append(jnp.concatenate(qk_cols, axis=1))          # (E, H*2*128)
        wvo_l.append(jnp.stack(wvo_h))                          # (H, E, E)
        w1_l.append(jnp.transpose(lp["linear1_weight"]))        # (E, F)
        w2_l.append(jnp.transpose(lp["linear2_weight"]))        # (F, E)

        vec = jnp.zeros((VEC_ROWS, VEC_LANES), jnp.float32)
        vec = vec.at[ROW_BQK, :2 * num_heads * dhp].set(jnp.concatenate(bqk_cols))
        for h in range(num_heads):
            vec = vec.at[ROW_BVO0 + h, :E].set(bvo_h[h])
        vec = vec.at[ROW_BO, :E].set(lp["out_proj_bias"])
        vec = vec.at[ROW_LN1W, :E].set(lp["ln1_weight"])
        vec = vec.at[ROW_LN1B, :E].set(lp["ln1_bias"])
        vec = vec.at[ROW_B1, :F].set(lp["linear1_bias"])
        vec = vec.at[ROW_B2, :E].set(lp["linear2_bias"])
        vec = vec.at[ROW_LN2W, :E].set(lp["ln2_weight"])
        vec = vec.at[ROW_LN2B, :E].set(lp["ln2_bias"])
        vec_l.append(vec)

    bf16 = jnp.bfloat16
    return dict(
        pos=tp["pos"],
        wqk=jnp.stack(wqk_l).astype(bf16),      # (L, E, 1024)
        wvo=jnp.stack(wvo_l).astype(bf16),      # (L, H, E, E)
        w1=jnp.stack(w1_l).astype(bf16),        # (L, E, F)
        w2=jnp.stack(w2_l).astype(bf16),        # (L, F, E)
        vec=jnp.stack(vec_l),                   # (L, 12, 1024) f32
        fcw=jnp.transpose(tp["fc_weight"]).astype(bf16),
        fcb=tp["fc_bias"][None, :],
    )


def long_time_regression(x, kp, num_layers, num_heads=N_HEAD):
    S, E = x.shape
    pos = kp["pos"][:S, :]                      # glue: slice position encodings to seq_len

    inputs = [
        x.astype(jnp.float32), pos,
        kp["wqk"], kp["wvo"], kp["w1"], kp["w2"], kp["vec"],
        kp["fcw"], kp["fcb"],
    ]

    def const_spec(a):                          # resident across all layer iterations
        return pl.BlockSpec(a.shape, lambda l, n=a.ndim: (0,) * n)

    def layer_spec(a):                          # streamed / double-buffered per layer
        return pl.BlockSpec((1,) + tuple(a.shape[1:]),
                            lambda l, n=a.ndim: (l,) + (0,) * (n - 1))

    in_specs = [
        const_spec(inputs[0]), const_spec(pos),
        layer_spec(kp["wqk"]), layer_spec(kp["wvo"]),
        layer_spec(kp["w1"]), layer_spec(kp["w2"]),
        layer_spec(kp["vec"]),
        const_spec(kp["fcw"]), const_spec(kp["fcb"]),
    ]

    # Advisory cost estimate.
    flops_layer = (2 * S * E * (2 * num_heads * DH_PAD)          # fused QK projection
                   + num_heads * (2 * S * S * DH_PAD)            # q k^T
                   + num_heads * (2 * S * E * E)                 # x @ W_vo_h
                   + num_heads * (2 * S * S * E)                 # p @ vo_h
                   + 2 * S * E * FFN_DIM * 2)                    # FFN
    flops = int(num_layers * flops_layer + 2 * S * E * E)
    transcendentals = int(num_layers * num_heads * S * S + S * E)
    bytes_accessed = int(sum(int(a.size) * a.dtype.itemsize for a in inputs) + S * E * 4)

    kernel = functools.partial(
        long_time_regression_kernel,
        num_heads=num_heads, head_dim=HEAD_DIM, head_dim_pad=DH_PAD,
    )
    return pl.pallas_call(
        kernel,
        out_shape=jax.ShapeDtypeStruct((S, E), jnp.float32),
        grid_spec=pltpu.PrefetchScalarGridSpec(
            num_scalar_prefetch=0,
            grid=(num_layers,),
            in_specs=in_specs,
            out_specs=pl.BlockSpec((S, E), lambda l: (0, 0)),
            scratch_shapes=[
                pltpu.VMEM((S, E), jnp.float32),   # x carried across layers
                pltpu.VMEM((S, S), jnp.float32),   # causal additive mask (built once)
            ],
        ),
        compiler_params=pltpu.CompilerParams(
            dimension_semantics=("arbitrary",),    # serial dependence over layers
            vmem_limit_bytes=32 * 1024 * 1024,
        ),
        cost_estimate=pl.CostEstimate(
            flops=flops, transcendentals=transcendentals, bytes_accessed=bytes_accessed),
    )(*inputs)
    # TODO(synk): for seq_len >= ~2k the unblocked (S,S) score matrix needs flash-style KV tiling
    # (size tiles against v7x's 64 MiB VMEM, not the 128 MiB of v5e/v6e).


if __name__ == "__main__":
    padding = 16
    num_layers = 2
    seq_len = 8

    key = jax.random.PRNGKey(0)
    k_param, k_x = jax.random.split(key)
    torch_params = init_torch_params(k_param, padding, num_layers)
    kparams = prepare_params(torch_params)
    x = jax.random.normal(k_x, (seq_len, MODEL_DIM), dtype=jnp.float32)

    out = long_time_regression(x, kparams, num_layers)
    out = jax.block_until_ready(out)
    assert out.shape == (seq_len, MODEL_DIM)
    assert bool(jnp.all(jnp.isfinite(out)))
    print("KERNEL_OK")
</pallas_src>

<mosaic_0001>
module attributes {stable_mosaic.version = 11 : i64} {
  func.func @long_time_regression_kernel(%arg0: i32, %arg1: memref<8x180xf32, #tpu.memory_space<vmem>>, %arg2: memref<8x180xf32, #tpu.memory_space<vmem>>, %arg3: memref<1x180x1024xbf16, #tpu.memory_space<vmem>>, %arg4: memref<1x4x180x180xbf16, #tpu.memory_space<vmem>>, %arg5: memref<1x180x720xbf16, #tpu.memory_space<vmem>>, %arg6: memref<1x720x180xbf16, #tpu.memory_space<vmem>>, %arg7: memref<1x12x1024xf32, #tpu.memory_space<vmem>>, %arg8: memref<180x180xbf16, #tpu.memory_space<vmem>>, %arg9: memref<1x180xf32, #tpu.memory_space<vmem>>, %arg10: memref<8x180xf32, #tpu.memory_space<vmem>>, %arg11: memref<8x180xf32, #tpu.memory_space<vmem>>, %arg12: memref<8x8xf32, #tpu.memory_space<vmem>>) attributes {dimension_semantics = [#tpu.dimension_semantics<arbitrary>], iteration_bounds = array<i64: 2>, scalar_prefetch = 0 : i64, scratch_operands = 2 : i64, tpu.core_type = #tpu.core_type<tc>, window_params = [{pipeline_mode = #tpu.pipeline_mode<synchronous>, transform_indices = @transform_0, window_bounds = array<i64: 8, 180>}, {pipeline_mode = #tpu.pipeline_mode<synchronous>, transform_indices = @transform_1, window_bounds = array<i64: 8, 180>}, {transform_indices = @transform_2, window_bounds = array<i64: 1, 180, 1024>}, {transform_indices = @transform_3, window_bounds = array<i64: 1, 4, 180, 180>}, {transform_indices = @transform_4, window_bounds = array<i64: 1, 180, 720>}, {transform_indices = @transform_5, window_bounds = array<i64: 1, 720, 180>}, {transform_indices = @transform_6, window_bounds = array<i64: 1, 12, 1024>}, {pipeline_mode = #tpu.pipeline_mode<synchronous>, transform_indices = @transform_7, window_bounds = array<i64: 180, 180>}, {pipeline_mode = #tpu.pipeline_mode<synchronous>, transform_indices = @transform_8, window_bounds = array<i64: 1, 180>}, {pipeline_mode = #tpu.pipeline_mode<synchronous>, transform_indices = @transform_9, window_bounds = array<i64: 8, 180>}]} {
    %c0_i32 = arith.constant 0 : i32
    %0 = arith.cmpi eq, %arg0, %c0_i32 : i32
    %1 = arith.extui %0 : i1 to i32
    %c0_i32_0 = arith.constant 0 : i32
    %2 = arith.cmpi ne, %1, %c0_i32_0 : i32
    scf.if %2 {
      %c0_95 = arith.constant 0 : index
      %c0_96 = arith.constant 0 : index
      %203 = vector.load %arg1[%c0_95, %c0_96] : memref<8x180xf32, #tpu.memory_space<vmem>>, vector<8x180xf32>
      %c0_97 = arith.constant 0 : index
      %c0_98 = arith.constant 0 : index
      %204 = vector.load %arg2[%c0_97, %c0_98] : memref<8x180xf32, #tpu.memory_space<vmem>>, vector<8x180xf32>
      %205 = arith.addf %203, %204 : vector<8x180xf32>
      %c0_99 = arith.constant 0 : index
      %c0_100 = arith.constant 0 : index
      %206 = vector.load %arg11[%c0_99, %c0_100] : memref<8x180xf32, #tpu.memory_space<vmem>>, vector<8x180xf32>
      tpu.vector_store %arg11[%c0_99, %c0_100], %205 {strides = array<i32>} : memref<8x180xf32, #tpu.memory_space<vmem>>, vector<8x180xf32>,
      %207 = tpu.iota {dimensions = array<i32: 0>} : vector<8x8xi32>
      %208 = tpu.iota {dimensions = array<i32: 1>} : vector<8x8xi32>
      %209 = arith.cmpi sle, %208, %207 : vector<8x8xi32>
      %cst_101 = arith.constant 0.000000e+00 : f32
      %cst_102 = arith.constant -1.000000e+30 : f32
      %210 = vector.broadcast %cst_101 : f32 to vector<8x8xf32>
      %211 = vector.broadcast %cst_102 : f32 to vector<8x8xf32>
      %212 = arith.select %209, %210, %211 : vector<8x8xi1>, vector<8x8xf32>
      %c0_103 = arith.constant 0 : index
      %c0_104 = arith.constant 0 : index
      %213 = vector.load %arg12[%c0_103, %c0_104] : memref<8x8xf32, #tpu.memory_space<vmem>>, vector<8x8xf32>
      tpu.vector_store %arg12[%c0_103, %c0_104], %212 {strides = array<i32>} : memref<8x8xf32, #tpu.memory_space<vmem>>, vector<8x8xf32>,
    } else {
    }
    %c0 = arith.constant 0 : index
    %c0_1 = arith.constant 0 : index
    %3 = vector.load %arg11[%c0, %c0_1] : memref<8x180xf32, #tpu.memory_space<vmem>>, vector<8x180xf32>
    %4 = arith.truncf %3 : vector<8x180xf32> to vector<8x180xbf16>
    %c0_2 = arith.constant 0 : index
    %c0_3 = arith.constant 0 : index
    %5 = vector.load %arg12[%c0_2, %c0_3] : memref<8x8xf32, #tpu.memory_space<vmem>>, vector<8x8xf32>
    %c0_4 = arith.constant 0 : index
    %c0_5 = arith.constant 0 : index
    %c0_6 = arith.constant 0 : index
    %6 = vector.load %arg3[%c0_4, %c0_5, %c0_6] : memref<1x180x1024xbf16, #tpu.memory_space<vmem>>, vector<1x180x1024xbf16>
    %7 = vector.shape_cast %6 : vector<1x180x1024xbf16> to vector<180x1024xbf16>
    %cst = arith.constant dense<0.000000e+00> : vector<8x1024xf32>
    %8 = tpu.matmul %4, %7, %cst {dimension_numbers = #tpu.dot_dimension_numbers<[1], [0], [0], [1], [0, 0, 1, 1], [], []>} : vector<8x180xbf16>, vector<180x1024xbf16>, vector<8x1024xf32> -> vector<8x1024xf32>
    %c0_7 = arith.constant 0 : index
    %c0_8 = arith.constant 0 : index
    %c0_9 = arith.constant 0 : index
    %9 = vector.load %arg7[%c0_7, %c0_8, %c0_9] : memref<1x12x1024xf32, #tpu.memory_space<vmem>>, vector<1x1x1024xf32>
    %10 = vector.shape_cast %9 : vector<1x1x1024xf32> to vector<1x1024xf32>
    %11 = vector.broadcast %10 : vector<1x1024xf32> to vector<8x1024xf32>
    %12 = arith.addf %8, %11 : vector<8x1024xf32>
    %13 = arith.truncf %12 : vector<8x1024xf32> to vector<8x1024xbf16>
    %cst_10 = arith.constant 0.000000e+00 : f32
    %14 = vector.broadcast %cst_10 : f32 to vector<8x180xf32>
    %15 = vector.extract_strided_slice %13 {offsets = [0, 0], sizes = [8, 128], strides = [1, 1]} : vector<8x1024xbf16> to vector<8x128xbf16>
    %16 = vector.extract_strided_slice %13 {offsets = [0, 128], sizes = [8, 128], strides = [1, 1]} : vector<8x1024xbf16> to vector<8x128xbf16>
    %cst_11 = arith.constant dense<0.000000e+00> : vector<8x8xf32>
    %17 = tpu.matmul %15, %16, %cst_11 {dimension_numbers = #tpu.dot_dimension_numbers<[1], [1], [0], [0], [0, 0, 1, 0], [], []>} : vector<8x128xbf16>, vector<8x128xbf16>, vector<8x8xf32> -> vector<8x8xf32>
    %cst_12 = arith.constant 0.149071202 : f32
    %18 = vector.broadcast %cst_12 : f32 to vector<8x8xf32>
    %19 = arith.mulf %17, %18 : vector<8x8xf32>
    %20 = arith.addf %19, %5 : vector<8x8xf32>
    %cst_13 = arith.constant dense<0xFF800000> : vector<8xf32>
    %21 = vector.multi_reduction <maximumf>, %20, %cst_13 [1] : vector<8x8xf32> to vector<8xf32>
    %22 = vector.shape_cast %21 : vector<8xf32> to vector<8x1xf32>
    %23 = vector.broadcast %22 : vector<8x1xf32> to vector<8x8xf32>
    %24 = arith.subf %20, %23 : vector<8x8xf32>
    %25 = math.exp %24 : vector<8x8xf32>
    %cst_14 = arith.constant dense<0.000000e+00> : vector<8xf32>
    %26 = vector.multi_reduction <add>, %25, %cst_14 [1] : vector<8x8xf32> to vector<8xf32>
    %27 = vector.shape_cast %26 : vector<8xf32> to vector<8x1xf32>
    %28 = tpu.reciprocal %27 {approx = true} : vector<8x1xf32> -> vector<8x1xf32>
    %29 = vector.broadcast %28 : vector<8x1xf32> to vector<8x8xf32>
    %30 = arith.mulf %25, %29 : vector<8x8xf32>
    %c0_15 = arith.constant 0 : index
    %c0_16 = arith.constant 0 : index
    %c0_17 = arith.constant 0 : index
    %c0_18 = arith.constant 0 : index
    %31 = vector.load %arg4[%c0_15, %c0_16, %c0_17, %c0_18] : memref<1x4x180x180xbf16, #tpu.memory_space<vmem>>, vector<1x1x180x180xbf16>
    %32 = vector.shape_cast %31 : vector<1x1x180x180xbf16> to vector<180x180xbf16>
    %cst_19 = arith.constant dense<0.000000e+00> : vector<8x180xf32>
    %33 = tpu.matmul %4, %32, %cst_19 {dimension_numbers = #tpu.dot_dimension_numbers<[1], [0], [0], [1], [0, 0, 1, 1], [], []>} : vector<8x180xbf16>, vector<180x180xbf16>, vector<8x180xf32> -> vector<8x180xf32>
    %c0_20 = arith.constant 0 : index
    %c1 = arith.constant 1 : index
    %c0_21 = arith.constant 0 : index
    %34 = vector.load %arg7[%c0_20, %c1, %c0_21] : memref<1x12x1024xf32, #tpu.memory_space<vmem>>, vector<1x1x180xf32>
    %35 = vector.shape_cast %34 : vector<1x1x180xf32> to vector<1x180xf32>
    %36 = vector.broadcast %35 : vector<1x180xf32> to vector<8x180xf32>
    %37 = arith.addf %33, %36 : vector<8x180xf32>
    %38 = arith.truncf %30 : vector<8x8xf32> to vector<8x8xbf16>
    %39 = arith.truncf %37 : vector<8x180xf32> to vector<8x180xbf16>
    %cst_22 = arith.constant dense<0.000000e+00> : vector<8x180xf32>
    %40 = tpu.matmul %38, %39, %cst_22 {dimension_numbers = #tpu.dot_dimension_numbers<[1], [0], [0], [1], [0, 0, 1, 1], [], []>} : vector<8x8xbf16>, vector<8x180xbf16>, vector<8x180xf32> -> vector<8x180xf32>
    %41 = arith.addf %14, %40 : vector<8x180xf32>
    %42 = vector.extract_strided_slice %13 {offsets = [0, 256], sizes = [8, 128], strides = [1, 1]} : vector<8x1024xbf16> to vector<8x128xbf16>
    %43 = vector.extract_strided_slice %13 {offsets = [0, 384], sizes = [8, 128], strides = [1, 1]} : vector<8x1024xbf16> to vector<8x128xbf16>
    %cst_23 = arith.constant dense<0.000000e+00> : vector<8x8xf32>
    %44 = tpu.matmul %42, %43, %cst_23 {dimension_numbers = #tpu.dot_dimension_numbers<[1], [1], [0], [0], [0, 0, 1, 0], [], []>} : vector<8x128xbf16>, vector<8x128xbf16>, vector<8x8xf32> -> vector<8x8xf32>
    %cst_24 = arith.constant 0.149071202 : f32
    %45 = vector.broadcast %cst_24 : f32 to vector<8x8xf32>
    %46 = arith.mulf %44, %45 : vector<8x8xf32>
    %47 = arith.addf %46, %5 : vector<8x8xf32>
    %cst_25 = arith.constant dense<0xFF800000> : vector<8xf32>
    %48 = vector.multi_reduction <maximumf>, %47, %cst_25 [1] : vector<8x8xf32> to vector<8xf32>
    %49 = vector.shape_cast %48 : vector<8xf32> to vector<8x1xf32>
    %50 = vector.broadcast %49 : vector<8x1xf32> to vector<8x8xf32>
    %51 = arith.subf %47, %50 : vector<8x8xf32>
    %52 = math.exp %51 : vector<8x8xf32>
    %cst_26 = arith.constant dense<0.000000e+00> : vector<8xf32>
    %53 = vector.multi_reduction <add>, %52, %cst_26 [1] : vector<8x8xf32> to vector<8xf32>
    %54 = vector.shape_cast %53 : vector<8xf32> to vector<8x1xf32>
    %55 = tpu.reciprocal %54 {approx = true} : vector<8x1xf32> -> vector<8x1xf32>
    %56 = vector.broadcast %55 : vector<8x1xf32> to vector<8x8xf32>
    %57 = arith.mulf %52, %56 : vector<8x8xf32>
    %c0_27 = arith.constant 0 : index
    %c1_28 = arith.constant 1 : index
    %c0_29 = arith.constant 0 : index
    %c0_30 = arith.constant 0 : index
    %58 = vector.load %arg4[%c0_27, %c1_28, %c0_29, %c0_30] : memref<1x4x180x180xbf16, #tpu.memory_space<vmem>>, vector<1x1x180x180xbf16>
    %59 = vector.shape_cast %58 : vector<1x1x180x180xbf16> to vector<180x180xbf16>
    %cst_31 = arith.constant dense<0.000000e+00> : vector<8x180xf32>
    %60 = tpu.matmul %4, %59, %cst_31 {dimension_numbers = #tpu.dot_dimension_numbers<[1], [0], [0], [1], [0, 0, 1, 1], [], []>} : vector<8x180xbf16>, vector<180x180xbf16>, vector<8x180xf32> -> vector<8x180xf32>
    %c0_32 = arith.constant 0 : index
    %c2 = arith.constant 2 : index
    %c0_33 = arith.constant 0 : index
    %61 = vector.load %arg7[%c0_32, %c2, %c0_33] : memref<1x12x1024xf32, #tpu.memory_space<vmem>>, vector<1x1x180xf32>
    %62 = vector.shape_cast %61 : vector<1x1x180xf32> to vector<1x180xf32>
    %63 = vector.broadcast %62 : vector<1x180xf32> to vector<8x180xf32>
    %64 = arith.addf %60, %63 : vector<8x180xf32>
    %65 = arith.truncf %57 : vector<8x8xf32> to vector<8x8xbf16>
    %66 = arith.truncf %64 : vector<8x180xf32> to vector<8x180xbf16>
    %cst_34 = arith.constant dense<0.000000e+00> : vector<8x180xf32>
    %67 = tpu.matmul %65, %66, %cst_34 {dimension_numbers = #tpu.dot_dimension_numbers<[1], [0], [0], [1], [0, 0, 1, 1], [], []>} : vector<8x8xbf16>, vector<8x180xbf16>, vector<8x180xf32> -> vector<8x180xf32>
    %68 = arith.addf %41, %67 : vector<8x180xf32>
    %69 = vector.extract_strided_slice %13 {offsets = [0, 512], sizes = [8, 128], strides = [1, 1]} : vector<8x1024xbf16> to vector<8x128xbf16>
    %70 = vector.extract_strided_slice %13 {offsets = [0, 640], sizes = [8, 128], strides = [1, 1]} : vector<8x1024xbf16> to vector<8x128xbf16>
    %cst_35 = arith.constant dense<0.000000e+00> : vector<8x8xf32>
    %71 = tpu.matmul %69, %70, %cst_35 {dimension_numbers = #tpu.dot_dimension_numbers<[1], [1], [0], [0], [0, 0, 1, 0], [], []>} : vector<8x128xbf16>, vector<8x128xbf16>, vector<8x8xf32> -> vector<8x8xf32>
    %cst_36 = arith.constant 0.149071202 : f32
    %72 = vector.broadcast %cst_36 : f32 to vector<8x8xf32>
    %73 = arith.mulf %71, %72 : vector<8x8xf32>
    %74 = arith.addf %73, %5 : vector<8x8xf32>
    %cst_37 = arith.constant dense<0xFF800000> : vector<8xf32>
    %75 = vector.multi_reduction <maximumf>, %74, %cst_37 [1] : vector<8x8xf32> to vector<8xf32>
    %76 = vector.shape_cast %75 : vector<8xf32> to vector<8x1xf32>
    %77 = vector.broadcast %76 : vector<8x1xf32> to vector<8x8xf32>
    %78 = arith.subf %74, %77 : vector<8x8xf32>
    %79 = math.exp %78 : vector<8x8xf32>
    %cst_38 = arith.constant dense<0.000000e+00> : vector<8xf32>
    %80 = vector.multi_reduction <add>, %79, %cst_38 [1] : vector<8x8xf32> to vector<8xf32>
    %81 = vector.shape_cast %80 : vector<8xf32> to vector<8x1xf32>
    %82 = tpu.reciprocal %81 {approx = true} : vector<8x1xf32> -> vector<8x1xf32>
    %83 = vector.broadcast %82 : vector<8x1xf32> to vector<8x8xf32>
    %84 = arith.mulf %79, %83 : vector<8x8xf32>
    %c0_39 = arith.constant 0 : index
    %c2_40 = arith.constant 2 : index
    %c0_41 = arith.constant 0 : index
    %c0_42 = arith.constant 0 : index
    %85 = vector.load %arg4[%c0_39, %c2_40, %c0_41, %c0_42] : memref<1x4x180x180xbf16, #tpu.memory_space<vmem>>, vector<1x1x180x180xbf16>
    %86 = vector.shape_cast %85 : vector<1x1x180x180xbf16> to vector<180x180xbf16>
    %cst_43 = arith.constant dense<0.000000e+00> : vector<8x180xf32>
    %87 = tpu.matmul %4, %86, %cst_43 {dimension_numbers = #tpu.dot_dimension_numbers<[1], [0], [0], [1], [0, 0, 1, 1], [], []>} : vector<8x180xbf16>, vector<180x180xbf16>, vector<8x180xf32> -> vector<8x180xf32>
    %c0_44 = arith.constant 0 : index
    %c3 = arith.constant 3 : index
    %c0_45 = arith.constant 0 : index
    %88 = vector.load %arg7[%c0_44, %c3, %c0_45] : memref<1x12x1024xf32, #tpu.memory_space<vmem>>, vector<1x1x180xf32>
    %89 = vector.shape_cast %88 : vector<1x1x180xf32> to vector<1x180xf32>
    %90 = vector.broadcast %89 : vector<1x180xf32> to vector<8x180xf32>
    %91 = arith.addf %87, %90 : vector<8x180xf32>
    %92 = arith.truncf %84 : vector<8x8xf32> to vector<8x8xbf16>
    %93 = arith.truncf %91 : vector<8x180xf32> to vector<8x180xbf16>
    %cst_46 = arith.constant dense<0.000000e+00> : vector<8x180xf32>
    %94 = tpu.matmul %92, %93, %cst_46 {dimension_numbers = #tpu.dot_dimension_numbers<[1], [0], [0], [1], [0, 0, 1, 1], [], []>} : vector<8x8xbf16>, vector<8x180xbf16>, vector<8x180xf32> -> vector<8x180xf32>
    %95 = arith.addf %68, %94 : vector<8x180xf32>
    %96 = vector.extract_strided_slice %13 {offsets = [0, 768], sizes = [8, 128], strides = [1, 1]} : vector<8x1024xbf16> to vector<8x128xbf16>
    %97 = vector.extract_strided_slice %13 {offsets = [0, 896], sizes = [8, 128], strides = [1, 1]} : vector<8x1024xbf16> to vector<8x128xbf16>
    %cst_47 = arith.constant dense<0.000000e+00> : vector<8x8xf32>
    %98 = tpu.matmul %96, %97, %cst_47 {dimension_numbers = #tpu.dot_dimension_numbers<[1], [1], [0], [0], [0, 0, 1, 0], [], []>} : vector<8x128xbf16>, vector<8x128xbf16>, vector<8x8xf32> -> vector<8x8xf32>
    %cst_48 = arith.constant 0.149071202 : f32
    %99 = vector.broadcast %cst_48 : f32 to vector<8x8xf32>
    %100 = arith.mulf %98, %99 : vector<8x8xf32>
    %101 = arith.addf %100, %5 : vector<8x8xf32>
    %cst_49 = arith.constant dense<0xFF800000> : vector<8xf32>
    %102 = vector.multi_reduction <maximumf>, %101, %cst_49 [1] : vector<8x8xf32> to vector<8xf32>
    %103 = vector.shape_cast %102 : vector<8xf32> to vector<8x1xf32>
    %104 = vector.broadcast %103 : vector<8x1xf32> to vector<8x8xf32>
    %105 = arith.subf %101, %104 : vector<8x8xf32>
    %106 = math.exp %105 : vector<8x8xf32>
    %cst_50 = arith.constant dense<0.000000e+00> : vector<8xf32>
    %107 = vector.multi_reduction <add>, %106, %cst_50 [1] : vector<8x8xf32> to vector<8xf32>
    %108 = vector.shape_cast %107 : vector<8xf32> to vector<8x1xf32>
    %109 = tpu.reciprocal %108 {approx = true} : vector<8x1xf32> -> vector<8x1xf32>
    %110 = vector.broadcast %109 : vector<8x1xf32> to vector<8x8xf32>
    %111 = arith.mulf %106, %110 : vector<8x8xf32>
    %c0_51 = arith.constant 0 : index
    %c3_52 = arith.constant 3 : index
    %c0_53 = arith.constant 0 : index
    %c0_54 = arith.constant 0 : index
    %112 = vector.load %arg4[%c0_51, %c3_52, %c0_53, %c0_54] : memref<1x4x180x180xbf16, #tpu.memory_space<vmem>>, vector<1x1x180x180xbf16>
    %113 = vector.shape_cast %112 : vector<1x1x180x180xbf16> to vector<180x180xbf16>
    %cst_55 = arith.constant dense<0.000000e+00> : vector<8x180xf32>
    %114 = tpu.matmul %4, %113, %cst_55 {dimension_numbers = #tpu.dot_dimension_numbers<[1], [0], [0], [1], [0, 0, 1, 1], [], []>} : vector<8x180xbf16>, vector<180x180xbf16>, vector<8x180xf32> -> vector<8x180xf32>
    %c0_56 = arith.constant 0 : index
    %c4 = arith.constant 4 : index
    %c0_57 = arith.constant 0 : index
    %115 = vector.load %arg7[%c0_56, %c4, %c0_57] : memref<1x12x1024xf32, #tpu.memory_space<vmem>>, vector<1x1x180xf32>
    %116 = vector.shape_cast %115 : vector<1x1x180xf32> to vector<1x180xf32>
    %117 = vector.broadcast %116 : vector<1x180xf32> to vector<8x180xf32>
    %118 = arith.addf %114, %117 : vector<8x180xf32>
    %119 = arith.truncf %111 : vector<8x8xf32> to vector<8x8xbf16>
    %120 = arith.truncf %118 : vector<8x180xf32> to vector<8x180xbf16>
    %cst_58 = arith.constant dense<0.000000e+00> : vector<8x180xf32>
    %121 = tpu.matmul %119, %120, %cst_58 {dimension_numbers = #tpu.dot_dimension_numbers<[1], [0], [0], [1], [0, 0, 1, 1], [], []>} : vector<8x8xbf16>, vector<8x180xbf16>, vector<8x180xf32> -> vector<8x180xf32>
    %122 = arith.addf %95, %121 : vector<8x180xf32>
    %c0_59 = arith.constant 0 : index
    %c5 = arith.constant 5 : index
    %c0_60 = arith.constant 0 : index
    %123 = vector.load %arg7[%c0_59, %c5, %c0_60] : memref<1x12x1024xf32, #tpu.memory_space<vmem>>, vector<1x1x180xf32>
    %124 = vector.shape_cast %123 : vector<1x1x180xf32> to vector<1x180xf32>
    %125 = vector.broadcast %124 : vector<1x180xf32> to vector<8x180xf32>
    %126 = arith.addf %122, %125 : vector<8x180xf32>
    %127 = arith.addf %3, %126 : vector<8x180xf32>
    %c0_61 = arith.constant 0 : index
    %c6 = arith.constant 6 : index
    %c0_62 = arith.constant 0 : index
    %128 = vector.load %arg7[%c0_61, %c6, %c0_62] : memref<1x12x1024xf32, #tpu.memory_space<vmem>>, vector<1x1x180xf32>
    %129 = vector.shape_cast %128 : vector<1x1x180xf32> to vector<1x180xf32>
    %c0_63 = arith.constant 0 : index
    %c7 = arith.constant 7 : index
    %c0_64 = arith.constant 0 : index
    %130 = vector.load %arg7[%c0_63, %c7, %c0_64] : memref<1x12x1024xf32, #tpu.memory_space<vmem>>, vector<1x1x180xf32>
    %131 = vector.shape_cast %130 : vector<1x1x180xf32> to vector<1x180xf32>
    %cst_65 = arith.constant dense<0.000000e+00> : vector<8xf32>
    %132 = vector.multi_reduction <add>, %127, %cst_65 [1] : vector<8x180xf32> to vector<8xf32>
    %133 = vector.shape_cast %132 : vector<8xf32> to vector<8x1xf32>
    %cst_66 = arith.constant 1.800000e+02 : f32
    %134 = vector.broadcast %cst_66 : f32 to vector<8x1xf32>
    %135 = arith.divf %133, %134 : vector<8x1xf32>
    %136 = vector.broadcast %135 : vector<8x1xf32> to vector<8x180xf32>
    %137 = arith.subf %127, %136 : vector<8x180xf32>
    %138 = arith.mulf %137, %137 : vector<8x180xf32>
    %cst_67 = arith.constant dense<0.000000e+00> : vector<8xf32>
    %139 = vector.multi_reduction <add>, %138, %cst_67 [1] : vector<8x180xf32> to vector<8xf32>
    %140 = vector.shape_cast %139 : vector<8xf32> to vector<8x1xf32>
    %cst_68 = arith.constant 1.800000e+02 : f32
    %141 = vector.broadcast %cst_68 : f32 to vector<8x1xf32>
    %142 = arith.divf %140, %141 : vector<8x1xf32>
    %143 = vector.broadcast %135 : vector<8x1xf32> to vector<8x180xf32>
    %144 = arith.subf %127, %143 : vector<8x180xf32>
    %cst_69 = arith.constant 9.99999974E-6 : f32
    %145 = vector.broadcast %cst_69 : f32 to vector<8x1xf32>
    %146 = arith.addf %142, %145 : vector<8x1xf32>
    %147 = math.rsqrt %146 : vector<8x1xf32>
    %148 = vector.broadcast %147 : vector<8x1xf32> to vector<8x180xf32>
    %149 = arith.mulf %144, %148 : vector<8x180xf32>
    %150 = vector.broadcast %129 : vector<1x180xf32> to vector<8x180xf32>
    %151 = arith.mulf %149, %150 : vector<8x180xf32>
    %152 = vector.broadcast %131 : vector<1x180xf32> to vector<8x180xf32>
    %153 = arith.addf %151, %152 : vector<8x180xf32>
    %154 = arith.truncf %153 : vector<8x180xf32> to vector<8x180xbf16>
    %c0_70 = arith.constant 0 : index
    %c0_71 = arith.constant 0 : index
    %c0_72 = arith.constant 0 : index
    %155 = vector.load %arg5[%c0_70, %c0_71, %c0_72] : memref<1x180x720xbf16, #tpu.memory_space<vmem>>, vector<1x180x720xbf16>
    %156 = vector.shape_cast %155 : vector<1x180x720xbf16> to vector<180x720xbf16>
    %cst_73 = arith.constant dense<0.000000e+00> : vector<8x720xf32>
    %157 = tpu.matmul %154, %156, %cst_73 {dimension_numbers = #tpu.dot_dimension_numbers<[1], [0], [0], [1], [0, 0, 1, 1], [], []>} : vector<8x180xbf16>, vector<180x720xbf16>, vector<8x720xf32> -> vector<8x720xf32>
    %c0_74 = arith.constant 0 : index
    %c8 = arith.constant 8 : index
    %c0_75 = arith.constant 0 : index
    %158 = vector.load %arg7[%c0_74, %c8, %c0_75] : memref<1x12x1024xf32, #tpu.memory_space<vmem>>, vector<1x1x720xf32>
    %159 = vector.shape_cast %158 : vector<1x1x720xf32> to vector<1x720xf32>
    %160 = vector.broadcast %159 : vector<1x720xf32> to vector<8x720xf32>
    %161 = arith.addf %157, %160 : vector<8x720xf32>
    %cst_76 = arith.constant 0.000000e+00 : f32
    %162 = vector.broadcast %cst_76 : f32 to vector<8x720xf32>
    %163 = arith.maximumf %161, %162 : vector<8x720xf32>
    %164 = arith.truncf %163 : vector<8x720xf32> to vector<8x720xbf16>
    %c0_77 = arith.constant 0 : index
    %c0_78 = arith.constant 0 : index
    %c0_79 = arith.constant 0 : index
    %165 = vector.load %arg6[%c0_77, %c0_78, %c0_79] : memref<1x720x180xbf16, #tpu.memory_space<vmem>>, vector<1x720x180xbf16>
    %166 = vector.shape_cast %165 : vector<1x720x180xbf16> to vector<720x180xbf16>
    %cst_80 = arith.constant dense<0.000000e+00> : vector<8x180xf32>
    %167 = tpu.matmul %164, %166, %cst_80 {dimension_numbers = #tpu.dot_dimension_numbers<[1], [0], [0], [1], [0, 0, 1, 1], [], []>} : vector<8x720xbf16>, vector<720x180xbf16>, vector<8x180xf32> -> vector<8x180xf32>
    %c0_81 = arith.constant 0 : index
    %c9 = arith.constant 9 : index
    %c0_82 = arith.constant 0 : index
    %168 = vector.load %arg7[%c0_81, %c9, %c0_82] : memref<1x12x1024xf32, #tpu.memory_space<vmem>>, vector<1x1x180xf32>
    %169 = vector.shape_cast %168 : vector<1x1x180xf32> to vector<1x180xf32>
    %170 = vector.broadcast %169 : vector<1x180xf32> to vector<8x180xf32>
    %171 = arith.addf %167, %170 : vector<8x180xf32>
    %172 = arith.addf %153, %171 : vector<8x180xf32>
    %c0_83 = arith.constant 0 : index
    %c10 = arith.constant 10 : index
    %c0_84 = arith.constant 0 : index
    %173 = vector.load %arg7[%c0_83, %c10, %c0_84] : memref<1x12x1024xf32, #tpu.memory_space<vmem>>, vector<1x1x180xf32>
    %174 = vector.shape_cast %173 : vector<1x1x180xf32> to vector<1x180xf32>
    %c0_85 = arith.constant 0 : index
    %c11 = arith.constant 11 : index
    %c0_86 = arith.constant 0 : index
    %175 = vector.load %arg7[%c0_85, %c11, %c0_86] : memref<1x12x1024xf32, #tpu.memory_space<vmem>>, vector<1x1x180xf32>
    %176 = vector.shape_cast %175 : vector<1x1x180xf32> to vector<1x180xf32>
    %cst_87 = arith.constant dense<0.000000e+00> : vector<8xf32>
    %177 = vector.multi_reduction <add>, %172, %cst_87 [1] : vector<8x180xf32> to vector<8xf32>
    %178 = vector.shape_cast %177 : vector<8xf32> to vector<8x1xf32>
    %cst_88 = arith.constant 1.800000e+02 : f32
    %179 = vector.broadcast %cst_88 : f32 to vector<8x1xf32>
    %180 = arith.divf %178, %179 : vector<8x1xf32>
    %181 = vector.broadcast %180 : vector<8x1xf32> to vector<8x180xf32>
    %182 = arith.subf %172, %181 : vector<8x180xf32>
    %183 = arith.mulf %182, %182 : vector<8x180xf32>
    %cst_89 = arith.constant dense<0.000000e+00> : vector<8xf32>
    %184 = vector.multi_reduction <add>, %183, %cst_89 [1] : vector<8x180xf32> to vector<8xf32>
    %185 = vector.shape_cast %184 : vector<8xf32> to vector<8x1xf32>
    %cst_90 = arith.constant 1.800000e+02 : f32
    %186 = vector.broadcast %cst_90 : f32 to vector<8x1xf32>
    %187 = arith.divf %185, %186 : vector<8x1xf32>
    %188 = vector.broadcast %180 : vector<8x1xf32> to vector<8x180xf32>
    %189 = arith.subf %172, %188 : vector<8x180xf32>
    %cst_91 = arith.constant 9.99999974E-6 : f32
    %190 = vector.broadcast %cst_91 : f32 to vector<8x1xf32>
    %191 = arith.addf %187, %190 : vector<8x1xf32>
    %192 = math.rsqrt %191 : vector<8x1xf32>
    %193 = vector.broadcast %192 : vector<8x1xf32> to vector<8x180xf32>
    %194 = arith.mulf %189, %193 : vector<8x180xf32>
    %195 = vector.broadcast %174 : vector<1x180xf32> to vector<8x180xf32>
    %196 = arith.mulf %194, %195 : vector<8x180xf32>
    %197 = vector.broadcast %176 : vector<1x180xf32> to vector<8x180xf32>
    %198 = arith.addf %196, %197 : vector<8x180xf32>
    %c0_92 = arith.constant 0 : index
    %c0_93 = arith.constant 0 : index
    %199 = vector.load %arg11[%c0_92, %c0_93] : memref<8x180xf32, #tpu.memory_space<vmem>>, vector<8x180xf32>
    tpu.vector_store %arg11[%c0_92, %c0_93], %198 {strides = array<i32>} : memref<8x180xf32, #tpu.memory_space<vmem>>, vector<8x180xf32>,
    %c1_i32 = arith.constant 1 : i32
    %200 = arith.cmpi eq, %arg0, %c1_i32 : i32
    %201 = arith.extui %200 : i1 to i32
    %c0_i32_94 = arith.constant 0 : i32
    %202 = arith.cmpi ne, %201, %c0_i32_94 : i32
    scf.if %202 {
      %203 = arith.truncf %198 : vector<8x180xf32> to vector<8x180xbf16>
      %c0_95 = arith.constant 0 : index
      %c0_96 = arith.constant 0 : index
      %204 = vector.load %arg8[%c0_95, %c0_96] : memref<180x180xbf16, #tpu.memory_space<vmem>>, vector<180x180xbf16>
      %cst_97 = arith.constant dense<0.000000e+00> : vector<8x180xf32>
      %205 = tpu.matmul %203, %204, %cst_97 {dimension_numbers = #tpu.dot_dimension_numbers<[1], [0], [0], [1], [0, 0, 1, 1], [], []>} : vector<8x180xbf16>, vector<180x180xbf16>, vector<8x180xf32> -> vector<8x180xf32>
      %c0_98 = arith.constant 0 : index
      %c0_99 = arith.constant 0 : index
      %206 = vector.load %arg9[%c0_98, %c0_99] : memref<1x180xf32, #tpu.memory_space<vmem>>, vector<1x180xf32>
      %207 = vector.broadcast %206 : vector<1x180xf32> to vector<8x180xf32>
      %208 = arith.addf %205, %207 : vector<8x180xf32>
      %cst_100 = arith.constant 0.000000e+00 : f32
      %209 = vector.broadcast %cst_100 : f32 to vector<8x180xf32>
      %210 = arith.cmpf ogt, %208, %209 : vector<8x180xf32>
      %211 = math.exp %208 : vector<8x180xf32>
      %cst_101 = arith.constant 1.000000e+00 : f32
      %212 = vector.broadcast %cst_101 : f32 to vector<8x180xf32>
      %213 = arith.subf %211, %212 : vector<8x180xf32>
      %cst_102 = arith.constant 1.67326319 : f32
      %214 = vector.broadcast %cst_102 : f32 to vector<8x180xf32>
      %215 = arith.mulf %214, %213 : vector<8x180xf32>
      %216 = arith.select %210, %208, %215 : vector<8x180xi1>, vector<8x180xf32>
      %cst_103 = arith.constant 1.05070102 : f32
      %217 = vector.broadcast %cst_103 : f32 to vector<8x180xf32>
      %218 = arith.mulf %217, %216 : vector<8x180xf32>
      %219 = arith.addf %218, %198 : vector<8x180xf32>
      %c0_104 = arith.constant 0 : index
      %c0_105 = arith.constant 0 : index
      %220 = vector.load %arg10[%c0_104, %c0_105] : memref<8x180xf32, #tpu.memory_space<vmem>>, vector<8x180xf32>
      tpu.vector_store %arg10[%c0_104, %c0_105], %219 {strides = array<i32>} : memref<8x180xf32, #tpu.memory_space<vmem>>, vector<8x180xf32>,
    } else {
    }
    return
  }
  func.func @transform_0(%arg0: i32) -> (i32, i32) {
    %c0_i32 = arith.constant 0 : i32
    %c0_i32_0 = arith.constant 0 : i32
    %c0_i32_1 = arith.constant 0 : i32
    return %c0_i32, %c0_i32_0 : i32, i32
  }
  func.func @transform_1(%arg0: i32) -> (i32, i32) {
    %c0_i32 = arith.constant 0 : i32
    %c0_i32_0 = arith.constant 0 : i32
    %c0_i32_1 = arith.constant 0 : i32
    return %c0_i32, %c0_i32_0 : i32, i32
  }
  func.func @transform_2(%arg0: i32) -> (i32, i32, i32) {
    %c0_i32 = arith.constant 0 : i32
    %c0_i32_0 = arith.constant 0 : i32
    %c0_i32_1 = arith.constant 0 : i32
    return %arg0, %c0_i32, %c0_i32_0 : i32, i32, i32
  }
  func.func @transform_3(%arg0: i32) -> (i32, i32, i32, i32) {
    %c0_i32 = arith.constant 0 : i32
    %c0_i32_0 = arith.constant 0 : i32
    %c0_i32_1 = arith.constant 0 : i32
    %c0_i32_2 = arith.constant 0 : i32
    return %arg0, %c0_i32, %c0_i32_0, %c0_i32_1 : i32, i32, i32, i32
  }
  func.func @transform_4(%arg0: i32) -> (i32, i32, i32) {
    %c0_i32 = arith.constant 0 : i32
    %c0_i32_0 = arith.constant 0 : i32
    %c0_i32_1 = arith.constant 0 : i32
    return %arg0, %c0_i32, %c0_i32_0 : i32, i32, i32
  }
  func.func @transform_5(%arg0: i32) -> (i32, i32, i32) {
    %c0_i32 = arith.constant 0 : i32
    %c0_i32_0 = arith.constant 0 : i32
    %c0_i32_1 = arith.constant 0 : i32
    return %arg0, %c0_i32, %c0_i32_0 : i32, i32, i32
  }
  func.func @transform_6(%arg0: i32) -> (i32, i32, i32) {
    %c0_i32 = arith.constant 0 : i32
    %c0_i32_0 = arith.constant 0 : i32
    %c0_i32_1 = arith.constant 0 : i32
    return %arg0, %c0_i32, %c0_i32_0 : i32, i32, i32
  }
  func.func @transform_7(%arg0: i32) -> (i32, i32) {
    %c0_i32 = arith.constant 0 : i32
    %c0_i32_0 = arith.constant 0 : i32
    %c0_i32_1 = arith.constant 0 : i32
    return %c0_i32, %c0_i32_0 : i32, i32
  }
  func.func @transform_8(%arg0: i32) -> (i32, i32) {
    %c0_i32 = arith.constant 0 : i32
    %c0_i32_0 = arith.constant 0 : i32
    %c0_i32_1 = arith.constant 0 : i32
    return %c0_i32, %c0_i32_0 : i32, i32
  }
  func.func @transform_9(%arg0: i32) -> (i32, i32) {
    %c0_i32 = arith.constant 0 : i32
    %c0_i32_0 = arith.constant 0 : i32
    %c0_i32_1 = arith.constant 0 : i32
    return %c0_i32, %c0_i32_0 : i32, i32
  }
}

</mosaic_0001>

<bundles_post_ra>
// kernel: tpu_custom_call.1
= control target key start
LH: loop header
LB: loop body
LE: loop exit
PB: predicated region body
PF: predicated region fallthrough
CT: control target
= control target key end

     0   :  { %14 = vsyncpa [#allocation5], 0  ;;  %s5276_s30 = smov 0   ;;  %s6002_s0 = inlined_call_operand.vmem [shape: f32[8,180], index: 0, kind: input, shape index: {}]   ;;  %s6003_s1 = inlined_call_operand.vmem [shape: f32[8,180], index: 1, kind: input, shape index: {}]   ;;  %s6004_s2 = inlined_call_operand.vmem [shape: bf16[2,180,1024], index: 2, kind: input, shape index: {}]   ;;  %s6005_s3 = inlined_call_operand.vmem [shape: bf16[2,4,180,180], index: 3, kind: input, shape index: {}]   ;;  %s6006_s4 = inlined_call_operand.vmem [shape: bf16[2,180,720], index: 4, kind: input, shape index: {}]   ;;  %s6007_s5 = inlined_call_operand.vmem [shape: bf16[2,720,180], index: 5, kind: input, shape index: {}]   ;;  %s6008_s6 = inlined_call_operand.vmem [shape: f32[2,12,1024], index: 6, kind: input, shape index: {}]   ;;  %s6009_s7 = inlined_call_operand.vmem [shape: bf16[180,180], index: 7, kind: input, shape index: {}]   ;;  %s6010_s8 = inlined_call_operand.vmem [shape: f32[1,180], index: 8, kind: input, shape index: {}]   ;;  %s6011_s9 = inlined_call_operand.hbm [shape: f32[8,180], index: 9, kind: output, shape index: {}]  }
   0x1 LB: > { %s5282_s10 = sadd.s32 4294967295, %s5219_s30   ;;  %p4174_p0 = scmp.ge.s32.totalorder %s5219_s30, 1  ;;  %s5219_s30 = sphi %s5276_s30, %s20_s30  }
   0x2   : > { %p323_p1 = scmp.lt.s32.totalorder %s5219_s30, 3 }
   0x4   : > { %p324_p2 = pnand %p4174_p0, %p323_p1 }
   0x5   : > { %p374_p3 = scmp.lt.s32.totalorder (!%p324_p2), %s5282_s10, 1  ;;  %p4181_p4 = scmp.ne.s32.totalorder (!%p324_p2), %s5282_s10, 0 }
   0x6   : > { %327 = sbr.rel (%p324_p2) target bundleno = 3145 (0xc49), region = 56 }
   0xb   : > { %s375_s11 = scalar_select %p374_p3, %s5282_s10, 1 }
   0xd   : > { %s4714_s12 = smul.u32 736, %s375_s11  ;;  %s4681_s13 = sshll.u32 %s375_s11, 7 }
   0xe   : > { %s4715_s14 = smul.u32 552, %s375_s11  ;;  %s5291_s17 = scalar_lea.vmem %s6008_s6, %s4681_s13 }
   0xf   : > { %s5296_s20 = scalar_lea.vmem %s6004_s2, %s4714_s12  ;;  %s5301_s23 = scalar_lea.vmem %s6005_s3, %s4714_s12 }
  0x10   : > { %s5306_s26 = scalar_lea.vmem %s6006_s4, %s4715_s14  ;;  %s4716_s27 = smul.u32 720, %s375_s11 }
  0x11   : > { %403 = sbr.rel (%p4181_p4) target bundleno = 29 (0x1d), region = 60 }
  0x12   : > { %s5311_s13 = scalar_lea.vmem %s6007_s5, %s4716_s27 }
  0x16   : > { %v404_v0 = vld [vmem:[%s6002_s0] sm:$0xff]  ;;  %v405_v2 = vld [vmem:[%s6002_s0 + $0x8] sm:$0xff]  ;;  %v413_v3 = vlaneseq  ;;  %vm411_vm0 = vcmask 424960   ;;  %vm419_vm1 = vcmask 64512   ;;  %v5221_v9 = vmov -1e+30  }
  0x17   : > { %v406_v1 = vld [vmem:[%s6003_s1] sm:$0xff]  ;;  %v407_v5 = vld [vmem:[%s6003_s1 + $0x8] sm:$0xff] }
  0x18   : > { %v408_v4 = vadd.f32 %v406_v1, %v404_v0  ;;  %v409_v6 = vadd.f32 %v407_v5, %v405_v2  ;;  %v414_v7 = vshrl.u32 %v413_v3, 7  ;;  %v416_v8 = vand.u32 127, %v413_v3 }
  0x1a   : > { %410 = vst [vmem:[#allocation2] sm:$0xff] %v408_v4  ;;  %412 = vst.msk [vmem:[#allocation2 + $0x8] sm:$0xff] %vm411_vm0, %v409_v6  ;;  %vm417_vm2 = vcmp.le.s32.totalorder %v416_v8, %v414_v7 }
  0x1b   : > { %v418_v10 = vsel %vm417_vm2, 0.0, %v5221_v9 }
  0x1c   : > { %420 = vst.msk [vmem:[#allocation3] sm:$0xff] %vm419_vm1, %v418_v10 }
  0x1d PF: > { %v482_v11 = vld [vmem:[%s5296_s20 + $0x1c0] sm:$0xff]  ;;  %v483_v13 = vld [vmem:[%s5296_s20 + $0x1c8] sm:$0xff]  ;;  %vm1022_vm3 = vcmask 424960   ;;  %vm1026_vm4 = vcmask 1041408   ;;  %vm5223_vm5 = vmmov 0   ;;  %vm1265_vm6 = vcmask 64512  }
  0x1e   : > { %v486_v12 = vld [vmem:[%s5296_s20 + $0x1e0] sm:$0xff]  ;;  %v487_v15 = vld [vmem:[%s5296_s20 + $0x1e8] sm:$0xff]  ;;  %vm1736_vm7 = vcmask 1043456   ;;  %vm3674_vm8 = vcmask 654336   ;;  %p4648_p5 = scmp.ne.s32.totalorder %s5282_s10, 1 }
  0x1f   : > { %v4239_v14 = vcombine.high %v482_v11, %v486_v12  ;;  %v4238_v16 = vcombine.low %v482_v11, %v486_v12  ;;  %v474_v17 = vld [vmem:[%s5296_s20 + $0x180] sm:$0xff]  ;;  %v4241_v19 = vcombine.high %v483_v13, %v487_v15  ;;  %v4240_v20 = vcombine.low %v483_v13, %v487_v15  ;;  %v475_v22 = vld [vmem:[%s5296_s20 + $0x188] sm:$0xff] }
  0x20   : > { %v478_v18 = vld [vmem:[%s5296_s20 + $0x1a0] sm:$0xff]  ;;  %v479_v23 = vld [vmem:[%s5296_s20 + $0x1a8] sm:$0xff] }
  0x21   : > { %v4231_v21 = vcombine.high %v474_v17, %v478_v18  ;;  %v466_v24 = vld [vmem:[%s5296_s20 + $0x140] sm:$0xff]  ;;  %1051 = vmatprep.subr.bf16.mxu0 %v4239_v14  ;;  %v4233_v25 = vcombine.high %v475_v22, %v479_v23  ;;  %v467_v27 = vld [vmem:[%s5296_s20 + $0x148] sm:$0xff]  ;;  %1092 = vmatprep.subr.bf16.mxu1 %v4241_v19  ;;  %v4230_v29 = vcombine.low %v474_v17, %v478_v18 }
  0x22   : > { %v470_v26 = vld [vmem:[%s5296_s20 + $0x160] sm:$0xff]  ;;  %v471_v28 = vld [vmem:[%s5296_s20 + $0x168] sm:$0xff]  ;;  %1052 = vmatpush1.bf16.msra.mxu0 %v4238_v16  ;;  %1093 = vmatpush1.bf16.msra.mxu1 %v4240_v20  ;;  %v4232_v30 = vcombine.low %v475_v22, %v479_v23 }
  0x23   : > { %1053 = vmatprep.subr.bf16.mxu0 %v4231_v21  ;;  %v4223_v31 = vcombine.high %v466_v24, %v470_v26  ;;  %1094 = vmatprep.subr.bf16.mxu1 %v4233_v25  ;;  %v4225_v32 = vcombine.high %v467_v27, %v471_v28  ;;  %v458_v33 = vld [vmem:[%s5296_s20 + $0x100] sm:$0xff]  ;;  %v459_v35 = vld [vmem:[%s5296_s20 + $0x108] sm:$0xff]  ;;  %v4222_v37 = vcombine.low %v466_v24, %v470_v26 }
  0x24   : > { %v462_v34 = vld [vmem:[%s5296_s20 + $0x120] sm:$0xff]  ;;  %v463_v36 = vld [vmem:[%s5296_s20 + $0x128] sm:$0xff]  ;;  %v4224_v38 = vcombine.low %v467_v27, %v471_v28 }
  0x25   : > { %v4215_v39 = vcombine.high %v458_v33, %v462_v34  ;;  %v4217_v40 = vcombine.high %v459_v35, %v463_v36  ;;  %v450_v41 = vld [vmem:[%s5296_s20 + $0xc0] sm:$0xff]  ;;  %v451_v43 = vld [vmem:[%s5296_s20 + $0xc8] sm:$0xff]  ;;  %v4214_v45 = vcombine.low %v458_v33, %v462_v34  ;;  %v4216_v46 = vcombine.low %v459_v35, %v463_v36 }
  0x26   : > { %1054 = vmatpush1.bf16.msra.mxu0 %v4230_v29  ;;  %1095 = vmatpush1.bf16.msra.mxu1 %v4232_v30  ;;  %v454_v42 = vld [vmem:[%s5296_s20 + $0xe0] sm:$0xff]  ;;  %v455_v44 = vld [vmem:[%s5296_s20 + $0xe8] sm:$0xff] }
  0x27   : > { %1055 = vmatprep.subr.bf16.mxu0 %v4223_v31  ;;  %1096 = vmatprep.subr.bf16.mxu1 %v4225_v32  ;;  %v4207_v47 = vcombine.high %v450_v41, %v454_v42  ;;  %v4209_v48 = vcombine.high %v451_v43, %v455_v44  ;;  %v442_v49 = vld [vmem:[%s5296_s20 + $0x80] sm:$0xff]  ;;  %v443_v51 = vld [vmem:[%s5296_s20 + $0x88] sm:$0xff]  ;;  %v4206_v54 = vcombine.low %v450_v41, %v454_v42  ;;  %v488_v41 = vld [vmem:[%s5296_s20 + $0x1f0] sm:$0xff] }
  0x28   : > { %v446_v50 = vld [vmem:[%s5296_s20 + $0xa0] sm:$0xff]  ;;  %v447_v52 = vld [vmem:[%s5296_s20 + $0xa8] sm:$0xff]  ;;  %v4208_v56 = vcombine.low %v451_v43, %v455_v44  ;;  %v485_v44 = vld [vmem:[%s5296_s20 + $0x1d8] sm:$0xff] }
  0x29   : > { %v422_v53 = vld [vmem:[#allocation2 + $0x8] sm:$0xff]  ;;  %v4199_v57 = vcombine.high %v442_v49, %v446_v50  ;;  %v4201_v58 = vcombine.high %v443_v51, %v447_v52  ;;  %v434_v59 = vld [vmem:[%s5296_s20 + $0x40] sm:$0xff]  ;;  %v4198_v63 = vcombine.low %v442_v49, %v446_v50  ;;  %v4200_v0 = vcombine.low %v443_v51, %v447_v52  ;;  %v476_v49 = vld [vmem:[%s5296_s20 + $0x190] sm:$0xff] }
  0x2a   : > { %1056 = vmatpush1.bf16.msra.mxu0 %v4222_v37  ;;  %1097 = vmatpush1.bf16.msra.mxu1 %v4224_v38  ;;  %v5350_v55 = vpack.c.bf16 %v422_v53, %v422_v53  ;;  %v438_v60 = vld [vmem:[%s5296_s20 + $0x60] sm:$0xff]  ;;  %v435_v61 = vld [vmem:[%s5296_s20 + $0x48] sm:$0xff]  ;;  %v480_v50 = vld [vmem:[%s5296_s20 + $0x1b0] sm:$0xff] }
  0x2b   : > { %1057 = vmatprep.subr.bf16.mxu0 %v4215_v39  ;;  %1098 = vmatprep.subr.bf16.mxu1 %v4217_v40  ;;  %v439_v62 = vld [vmem:[%s5296_s20 + $0x68] sm:$0xff]  ;;  %v4191_v1 = vcombine.high %v434_v59, %v438_v60  ;;  %v426_v3 = vld [vmem:[%s5296_s20] sm:$0xff]  ;;  %v4190_v7 = vcombine.low %v434_v59, %v438_v60  ;;  %v484_v40 = vld [vmem:[%s5296_s20 + $0x1d0] sm:$0xff] }
  0x2c   : > { %4279 = vmatprep.mubr.msk.bf16.mxu0 %vm1022_vm3, %v5350_v55  ;;  %4281 = vmatprep.mubr.msk.bf16.mxu1 %vm1022_vm3, %v5350_v55  ;;  %v4193_v2 = vcombine.high %v435_v61, %v439_v62  ;;  %v430_v4 = vld [vmem:[%s5296_s20 + $0x20] sm:$0xff]  ;;  %v427_v5 = vld [vmem:[%s5296_s20 + $0x8] sm:$0xff]  ;;  %v4192_v8 = vcombine.low %v435_v61, %v439_v62  ;;  %v4243_v52 = vcombine.high %v484_v40, %v488_v41  ;;  %v468_v59 = vld [vmem:[%s5296_s20 + $0x150] sm:$0xff] }
  0x2d   : > { %v431_v6 = vld [vmem:[%s5296_s20 + $0x28] sm:$0xff]  ;;  %v4183_v9 = vcombine.high %v426_v3, %v430_v4  ;;  %v514_v11 = vld [vmem:[%s5296_s20 + $0x2c0] sm:$0x33]  ;;  %v4182_v13 = vcombine.low %v426_v3, %v430_v4  ;;  %v472_v60 = vld [vmem:[%s5296_s20 + $0x170] sm:$0xff]  ;;  %v4235_v61 = vcombine.high %v476_v49, %v480_v50 }
  0x2e   : > { %1058 = vmatpush1.bf16.msra.mxu0 %v4214_v45  ;;  %1099 = vmatpush1.bf16.msra.mxu1 %v4216_v46  ;;  %v4185_v10 = vcombine.high %v427_v5, %v431_v6  ;;  %v515_v12 = vld [vmem:[%s5296_s20 + $0x2c8] sm:$0x33]  ;;  %v4184_v14 = vcombine.low %v427_v5, %v431_v6  ;;  %v4271_v15 = vcombine.high %v514_v11, %v514_v11  ;;  %v506_v19 = vld [vmem:[%s5296_s20 + $0x280] sm:$0xff]  ;;  %v489_v45 = vld [vmem:[%s5296_s20 + $0x1f8] sm:$0xff] }
  0x2f   : > { %1059 = vmatprep.subr.bf16.mxu0 %v4207_v47  ;;  %1100 = vmatprep.subr.bf16.mxu1 %v4209_v48  ;;  %v4270_v16 = vcombine.low %v514_v11, %v514_v11  ;;  %v4273_v17 = vcombine.high %v515_v12, %v515_v12  ;;  %v4272_v18 = vcombine.low %v515_v12, %v515_v12  ;;  %v510_v20 = vld [vmem:[%s5296_s20 + $0x2a0] sm:$0xff]  ;;  %v507_v21 = vld [vmem:[%s5296_s20 + $0x288] sm:$0xff]  ;;  %v460_v3 = vld [vmem:[%s5296_s20 + $0x110] sm:$0xff] }
  0x30   : > { %v511_v22 = vld [vmem:[%s5296_s20 + $0x2a8] sm:$0xff]  ;;  %v498_v23 = vld [vmem:[%s5296_s20 + $0x240] sm:$0xff]  ;;  %v4263_v26 = vcombine.high %v506_v19, %v510_v20  ;;  %v4262_v31 = vcombine.low %v506_v19, %v510_v20  ;;  %v4245_v53 = vcombine.high %v485_v44, %v489_v45  ;;  %v4244_v62 = vcombine.low %v485_v44, %v489_v45  ;;  %v464_v4 = vld [vmem:[%s5296_s20 + $0x130] sm:$0xff] }
  0x31   : > { %v502_v24 = vld [vmem:[%s5296_s20 + $0x260] sm:$0xff]  ;;  %v1028_v25 = vsel %vm1026_vm4, %v4270_v16, 0  ;;  %v499_v27 = vld [vmem:[%s5296_s20 + $0x248] sm:$0xff]  ;;  %v1034_v29 = vsel %vm1026_vm4, %v4272_v18, 0  ;;  %v4265_v30 = vcombine.high %v507_v21, %v511_v22  ;;  %v4264_v34 = vcombine.low %v507_v21, %v511_v22  ;;  %v452_v11 = vld [vmem:[%s5296_s20 + $0xd0] sm:$0xff] }
  0x32   : > { %1060 = vmatpush1.bf16.msra.mxu0 %v4206_v54  ;;  %1101 = vmatpush1.bf16.msra.mxu1 %v4208_v56  ;;  %v503_v28 = vld [vmem:[%s5296_s20 + $0x268] sm:$0xff]  ;;  %v490_v32 = vld [vmem:[%s5296_s20 + $0x200] sm:$0xff]  ;;  %v4255_v35 = vcombine.high %v498_v23, %v502_v24  ;;  %v4254_v39 = vcombine.low %v498_v23, %v502_v24  ;;  %v477_v54 = vld [vmem:[%s5296_s20 + $0x198] sm:$0xff]  ;;  %v4227_v5 = vcombine.high %v468_v59, %v472_v60 }
  0x33   : > { %1061 = vmatprep.subr.bf16.mxu0 %v4199_v57  ;;  %1102 = vmatprep.subr.bf16.mxu1 %v4201_v58  ;;  %v494_v33 = vld [vmem:[%s5296_s20 + $0x220] sm:$0xff]  ;;  %v491_v36 = vld [vmem:[%s5296_s20 + $0x208] sm:$0xff]  ;;  %v4257_v38 = vcombine.high %v499_v27, %v503_v28  ;;  %v4256_v42 = vcombine.low %v499_v27, %v503_v28  ;;  %v481_v56 = vld [vmem:[%s5296_s20 + $0x1b8] sm:$0xff]  ;;  %v4242_v58 = vcombine.low %v484_v40, %v488_v41 }
  0x34   : > { %v495_v37 = vld [vmem:[%s5296_s20 + $0x228] sm:$0xff]  ;;  %v4247_v43 = vcombine.high %v490_v32, %v494_v33  ;;  %v421_v47 = vld [vmem:[#allocation2] sm:$0xff]  ;;  %v4246_v48 = vcombine.low %v490_v32, %v494_v33  ;;  %v4236_v6 = vcombine.low %v477_v54, %v481_v56  ;;  %v456_v12 = vld [vmem:[%s5296_s20 + $0xf0] sm:$0xff]  ;;  %v4218_v18 = vcombine.low %v460_v3, %v464_v4 }
  0x35   : > { %v4249_v46 = vcombine.high %v491_v36, %v495_v37  ;;  %v4248_v51 = vcombine.low %v491_v36, %v495_v37  ;;  %v5390_v57 = vpack.c.bf16 %v421_v47, %v421_v47  ;;  %v457_v16 = vld [vmem:[%s5296_s20 + $0xf8] sm:$0xff]  ;;  %v444_v19 = vld [vmem:[%s5296_s20 + $0x90] sm:$0xff]  ;;  %v4211_v21 = vcombine.high %v452_v11, %v456_v12 }
  0x36   : > { %1062 = vmatpush1.bf16.msra.mxu0 %v4198_v63  ;;  %1103 = vmatpush1.bf16.msra.mxu1 %v4200_v0  ;;  %v469_v63 = vld [vmem:[%s5296_s20 + $0x158] sm:$0xff]  ;;  %v448_v20 = vld [vmem:[%s5296_s20 + $0xb0] sm:$0xff] }
  0x37   : > { %1063 = vmatprep.subr.bf16.mxu0 %v4191_v1  ;;  %1104 = vmatprep.subr.bf16.mxu1 %v4193_v2  ;;  %v473_v0 = vld [vmem:[%s5296_s20 + $0x178] sm:$0xff]  ;;  %v4237_v1 = vcombine.high %v477_v54, %v481_v56  ;;  %v4234_v2 = vcombine.low %v476_v49, %v480_v50  ;;  %v436_v27 = vld [vmem:[%s5296_s20 + $0x50] sm:$0xff] }
  0x38   : > { %v445_v23 = vld [vmem:[%s5296_s20 + $0x98] sm:$0xff]  ;;  %v440_v28 = vld [vmem:[%s5296_s20 + $0x70] sm:$0xff] }
  0x39   : > { %v449_v24 = vld [vmem:[%s5296_s20 + $0xb8] sm:$0xff]  ;;  %v432_v36 = vld [vmem:[%s5296_s20 + $0x30] sm:$0xff]  ;;  %v4195_v37 = vcombine.high %v436_v27, %v440_v28 }
  0x3a   : > { %1064 = vmatpush1.bf16.msra.mxu0 %v4190_v7  ;;  %1105 = vmatpush1.bf16.msra.mxu1 %v4192_v8  ;;  %v461_v7 = vld [vmem:[%s5296_s20 + $0x118] sm:$0xff]  ;;  %v4205_v33 = vcombine.high %v445_v23, %v449_v24  ;;  %v508_v49 = vld [vmem:[%s5296_s20 + $0x290] sm:$0xff] }
  0x3b   : > { %1065 = vmatprep.subr.bf16.mxu0 %v4183_v9  ;;  %1106 = vmatprep.subr.bf16.mxu1 %v4185_v10  ;;  %v465_v8 = vld [vmem:[%s5296_s20 + $0x138] sm:$0xff]  ;;  %v4229_v9 = vcombine.high %v469_v63, %v473_v0  ;;  %v4226_v10 = vcombine.low %v468_v59, %v472_v60  ;;  %v512_v50 = vld [vmem:[%s5296_s20 + $0x2b0] sm:$0xff] }
  0x3c   : > { %v4220_v22 = vcombine.low %v461_v7, %v465_v8  ;;  %v441_v32 = vld [vmem:[%s5296_s20 + $0x78] sm:$0xff]  ;;  %v500_v60 = vld [vmem:[%s5296_s20 + $0x250] sm:$0xff] }
  0x3d   : > { %v433_v40 = vld [vmem:[%s5296_s20 + $0x38] sm:$0xff] }
  0x3e   : > { %1066 = vmatpush1.bf16.msra.mxu0 %v4182_v13  ;;  %1107 = vmatpush1.bf16.msra.mxu1 %v4184_v14  ;;  %v4219_v13 = vcombine.high %v460_v3, %v464_v4  ;;  %v4228_v14 = vcombine.low %v469_v63, %v473_v0  ;;  %v509_v54 = vld [vmem:[%s5296_s20 + $0x298] sm:$0xff]  ;;  %v4267_v63 = vcombine.high %v508_v49, %v512_v50 }
  0x3f   : > { %4278 = vmatprep.subr.msk.bf16.mxu0 %vm1026_vm4, %v4271_v15  ;;  %4280 = vmatprep.subr.msk.bf16.mxu1 %vm1026_vm4, %v4273_v17  ;;  %v453_v15 = vld [vmem:[%s5296_s20 + $0xd8] sm:$0xff]  ;;  %v4221_v17 = vcombine.high %v461_v7, %v465_v8  ;;  %v4266_v4 = vcombine.low %v508_v49, %v512_v50 }
  0x40   : > { %v513_v56 = vld [vmem:[%s5296_s20 + $0x2b8] sm:$0xff] }
  0x41   : > { %v501_v0 = vld [vmem:[%s5296_s20 + $0x258] sm:$0xff]  ;;  %v4269_v3 = vcombine.high %v509_v54, %v513_v56  ;;  %v4268_v8 = vcombine.low %v509_v54, %v513_v56 }
  0x42   : > { %1076 = vmatpush2.bf16.msra.mxu0 %v1028_v25  ;;  %1117 = vmatpush2.bf16.msra.mxu1 %v1034_v29  ;;  %v4213_v25 = vcombine.high %v453_v15, %v457_v16  ;;  %v4203_v29 = vcombine.high %v444_v19, %v448_v20  ;;  %v4749_v50 = vld [vmem:[%s5301_s23 + $0x11c] ss:$8 sps:$4 sm:$0xff]   ;;  %v4753_v56 = vld [vmem:[%s5301_s23 + $0xf8] ss:$8 sps:$4 sm:$0xff]  }
  0x43   : > { %1077 = vmatprep.subr.bf16.mxu0 %v4263_v26  ;;  %1118 = vmatprep.subr.bf16.mxu1 %v4265_v30  ;;  %v4210_v26 = vcombine.low %v452_v11, %v456_v12  ;;  %v4212_v30 = vcombine.low %v453_v15, %v457_v16  ;;  %v497_v15 = vld [vmem:[%s5296_s20 + $0x238] sm:$0xff] }
  0x44   : > { %v4755_v54 = vld [vmem:[%s5301_s23 + $0xfc] ss:$8 sps:$4 sm:$0xff]  }
  0x46   : > { %1078 = vmatpush2.bf16.msra.mxu0 %v4262_v31  ;;  %1119 = vmatpush2.bf16.msra.mxu1 %v4264_v34  ;;  %v437_v31 = vld [vmem:[%s5296_s20 + $0x58] sm:$0xff]  ;;  %v4202_v34 = vcombine.low %v444_v19, %v448_v20  ;;  %v522_v19 = vlaneseq }
  0x47   : > { %1079 = vmatprep.subr.bf16.mxu0 %v4255_v35  ;;  %1120 = vmatprep.subr.bf16.mxu1 %v4257_v38  ;;  %v428_v35 = vld [vmem:[%s5296_s20 + $0x10] sm:$0xff]  ;;  %v4204_v38 = vcombine.low %v445_v23, %v449_v24  ;;  %v4197_v41 = vcombine.high %v437_v31, %v441_v32  ;;  %v4196_v45 = vcombine.low %v437_v31, %v441_v32 }
  0x48   : > { %v4187_v44 = vcombine.high %v428_v35, %v432_v36  ;;  %v5448_v20 = vshrl.u32 %v522_v19, 7 }
  0x4a   : > { %1080 = vmatpush2.bf16.msra.mxu0 %v4254_v39  ;;  %1121 = vmatpush2.bf16.msra.mxu1 %v4256_v42  ;;  %v429_v39 = vld [vmem:[%s5296_s20 + $0x18] sm:$0xff]  ;;  %v4194_v42 = vcombine.low %v436_v27, %v440_v28  ;;  %v5453_v23 = vsub.s32 1, %v5448_v20  ;;  %v536_v24 = vsub.s32 3, %v5448_v20 }
  0x4b   : > { %1081 = vmatprep.subr.bf16.mxu0 %v4247_v43  ;;  %1122 = vmatprep.subr.bf16.mxu1 %v4249_v46  ;;  %v516_v43 = vld [vmem:[%s5296_s20 + $0x2d0] sm:$0x33]  ;;  %v517_v46 = vld [vmem:[%s5296_s20 + $0x2d8] sm:$0x33]  ;;  %v4189_v47 = vcombine.high %v429_v39, %v433_v40 }
  0x4c   : > { %v4276_v59 = vcombine.low %v517_v46, %v517_v46 }
  0x4e   : > { %1082 = vmatpush2.bf16.msra.mxu0 %v4246_v48  ;;  %1123 = vmatpush2.bf16.msra.mxu1 %v4248_v51  ;;  %v4186_v48 = vcombine.low %v428_v35, %v432_v36  ;;  %v4275_v51 = vcombine.high %v516_v43, %v516_v43 }
  0x4f   : > { %1133 = vmatprep.subr.bf16.mxu0 %v4243_v52  ;;  %1174 = vmatprep.subr.bf16.mxu1 %v4245_v53  ;;  %v4274_v52 = vcombine.low %v516_v43, %v516_v43  ;;  %v4188_v53 = vcombine.low %v429_v39, %v433_v40 }
  0x51   : > { %1084 = vmatmul.mubr.bf16.vlgmr.msra.gmra.mxu0 %v5390_v57  ;;  %1125 = vmatmul.mubr.bf16.vlgmr.msra.gmra.mxu1 %v5390_v57 }
  0x52   : > { %1134 = vmatpush1.bf16.msra.mxu0 %v4242_v58  ;;  %4283 = vmatprep.mubr.msk.bf16.mxu0 %vm1022_vm3, %v5350_v55  ;;  %v4277_v58 = vcombine.high %v517_v46, %v517_v46 }
  0x53   : > { %1135 = vmatprep.subr.bf16.mxu0 %v4235_v61  ;;  %1175 = vmatpush1.bf16.msra.mxu1 %v4244_v62  ;;  %v504_v61 = vld [vmem:[%s5296_s20 + $0x270] sm:$0xff]  ;;  %v1040_v62 = vsel %vm1026_vm4, %v4274_v52, 0 }
  0x54   : > { %4285 = vmatprep.mubr.msk.bf16.mxu1 %vm1022_vm3, %v5350_v55  ;;  %1176 = vmatprep.subr.bf16.mxu1 %v4237_v1  ;;  %v505_v1 = vld [vmem:[%s5296_s20 + $0x278] sm:$0xff]  ;;  %v4259_v7 = vcombine.high %v500_v60, %v504_v61  ;;  %v4752_v52 = vld [vmem:[%s5301_s23 + $0x10c] ss:$8 sps:$4 sm:$0xff]  }
  0x55   : > { %v4260_v12 = vcombine.low %v501_v0, %v505_v1 }
  0x56   : > { %1136 = vmatpush1.bf16.msra.mxu0 %v4234_v2  ;;  %v1046_v2 = vsel %vm1026_vm4, %v4276_v59, 0  ;;  %v4756_v59 = vld [vmem:[%s5301_s23 + $0xe8] ss:$8 sps:$4 sm:$0xff]  }
  0x57   : > { %1137 = vmatprep.subr.bf16.mxu0 %v4227_v5  ;;  %1177 = vmatpush1.bf16.msra.mxu1 %v4236_v6  ;;  %v492_v5 = vld [vmem:[%s5296_s20 + $0x210] sm:$0xff] }
  0x58   : > { %1178 = vmatprep.subr.bf16.mxu1 %v4229_v9  ;;  %v496_v6 = vld [vmem:[%s5296_s20 + $0x230] sm:$0xff]  ;;  %v4261_v9 = vcombine.high %v501_v0, %v505_v1  ;;  %v4767_v0 = vld [vmem:[%s5301_s23 + $0xbc] ss:$8 sps:$4 sm:$0xff]   ;;  %v4335_v1 = vld [vmem:[%s5301_s23 + $0x168] sm:$0x33] }
  0x59   : > { %v4251_v11 = vcombine.high %v492_v5, %v496_v6 }
  0x5a   : > { %1138 = vmatpush1.bf16.msra.mxu0 %v4226_v10  ;;  %v4258_v10 = vcombine.low %v500_v60, %v504_v61  ;;  %v4761_v60 = vld [vmem:[%s5301_s23 + $0xdc] ss:$8 sps:$4 sm:$0xff]   ;;  %v4759_v61 = vld [vmem:[%s5301_s23 + $0xd8] ss:$8 sps:$4 sm:$0xff]  }
  0x5b   : > { %1139 = vmatprep.subr.bf16.mxu0 %v4219_v13  ;;  %1179 = vmatpush1.bf16.msra.mxu1 %v4228_v14  ;;  %v4250_v13 = vcombine.low %v492_v5, %v496_v6  ;;  %v493_v14 = vld [vmem:[%s5296_s20 + $0x218] sm:$0xff] }
  0x5c   : > { %1180 = vmatprep.subr.bf16.mxu1 %v4221_v17  ;;  %v4253_v16 = vcombine.high %v493_v14, %v497_v15  ;;  %v4252_v17 = vcombine.low %v493_v14, %v497_v15  ;;  %v4772_v6 = vld [vmem:[%s5301_s23 + $0x15c] ss:$8 sps:$4 sm:$0xff]  }
  0x5d   : > { %v4778_v15 = vld [vmem:[%s5301_s23 + $0x13c] ss:$8 sps:$4 sm:$0xff]  }
  0x5e   : > { %1140 = vmatpush1.bf16.msra.mxu0 %v4218_v18  ;;  %v5222_v18 = vmov 0.0  }
  0x5f   : > { %1141 = vmatprep.subr.bf16.mxu0 %v4211_v21  ;;  %1181 = vmatpush1.bf16.msra.mxu1 %v4220_v22  ;;  %v518_v21 = vld [vmem:[%s5291_s17] ss:$8 sm:$0xf] }
  0x60   : > { %1182 = vmatprep.subr.bf16.mxu1 %v4213_v25  ;;  %v519_v22 = vld [vmem:[%s5291_s17] ss:$8 sm:$0xf0] }
  0x61   : > { %v5456_v25 = vor.u32 %v519_v22, %v518_v21  ;;  %v4776_v21 = vld [vmem:[%s5301_s23 + $0x138] ss:$8 sps:$4 sm:$0xff]  }
  0x62   : > { %1142 = vmatpush1.bf16.msra.mxu0 %v4210_v26  ;;  %v5459_v26 = vsub.s32 0, %v5448_v20 }
  0x63   : > { %1143 = vmatprep.subr.bf16.mxu0 %v4203_v29  ;;  %1183 = vmatpush1.bf16.msra.mxu1 %v4212_v30  ;;  %v529_v27 = vrot.slane %v5456_v25, %v5453_v23  ;;  %v537_v29 = vrot.slane %v5456_v25, %v536_v24  ;;  %v532_v30 = vsub.s32 2, %v5448_v20 }
  0x64   : > { %1184 = vmatprep.subr.bf16.mxu1 %v4205_v33  ;;  %v525_v32 = vrot.slane %v5456_v25, %v5459_v26 }
  0x66   : > { %1144 = vmatpush1.bf16.msra.mxu0 %v4202_v34 }
  0x67   : > { %1145 = vmatprep.subr.bf16.mxu0 %v4195_v37  ;;  %1185 = vmatpush1.bf16.msra.mxu1 %v4204_v38  ;;  %v533_v38 = vrot.slane %v5456_v25, %v532_v30 }
  0x68   : > { %1186 = vmatprep.subr.bf16.mxu1 %v4197_v41  ;;  %v4746_v41 = vld [vmem:[%s5301_s23 + $0x12c] ss:$8 sps:$4 sm:$0xff]  }
  0x6a   : > { %1146 = vmatpush1.bf16.msra.mxu0 %v4194_v42 }
  0x6b   : > { %1147 = vmatprep.subr.bf16.mxu0 %v4187_v44  ;;  %1187 = vmatpush1.bf16.msra.mxu1 %v4196_v45 }
  0x6c   : > { %1188 = vmatprep.subr.bf16.mxu1 %v4189_v47 }
  0x6e   : > { %1148 = vmatpush1.bf16.msra.mxu0 %v4186_v48  ;;  %v4744_v48 = vld [vmem:[%s5301_s23 + $0x128] ss:$8 sps:$4 sm:$0xff]  }
  0x6f   : > { %4282 = vmatprep.subr.msk.bf16.mxu0 %vm1026_vm4, %v4275_v51  ;;  %1189 = vmatpush1.bf16.msra.mxu1 %v4188_v53  ;;  %v4747_v51 = vld [vmem:[%s5301_s23 + $0x118] ss:$8 sps:$4 sm:$0xff]   ;;  %v4750_v53 = vld [vmem:[%s5301_s23 + $0x108] ss:$8 sps:$4 sm:$0xff]  }
  0x70   : > { %4284 = vmatprep.subr.msk.bf16.mxu1 %vm1026_vm4, %v4277_v58  ;;  %v4758_v58 = vld [vmem:[%s5301_s23 + $0xec] ss:$8 sps:$4 sm:$0xff]  }
  0x72   : > { %1158 = vmatpush2.bf16.msra.mxu0 %v1040_v62  ;;  %v4764_v62 = vld [vmem:[%s5301_s23 + $0xcc] ss:$8 sps:$4 sm:$0xff]  }
  0x73   : > { %1159 = vmatprep.subr.bf16.mxu0 %v4267_v63  ;;  %1199 = vmatpush2.bf16.msra.mxu1 %v1046_v2  ;;  %v4762_v63 = vld [vmem:[%s5301_s23 + $0xc8] ss:$8 sps:$4 sm:$0xff]   ;;  %v4765_v2 = vld [vmem:[%s5301_s23 + $0xb8] ss:$8 sps:$4 sm:$0xff]  }
  0x74   : > { %1200 = vmatprep.subr.bf16.mxu1 %v4269_v3  ;;  %v4360_v3 = vcombine.high %v4335_v1, %v4335_v1 }
  0x76   : > { %1160 = vmatpush2.bf16.msra.mxu0 %v4266_v4  ;;  %v4359_v4 = vcombine.low %v4335_v1, %v4335_v1  ;;  %v5543_v1 = vld [vmem:[#allocation3] sm:$0xff] }
  0x77   : > { %1161 = vmatprep.subr.bf16.mxu0 %v4259_v7  ;;  %1201 = vmatpush2.bf16.msra.mxu1 %v4268_v8  ;;  %v4770_v7 = vld [vmem:[%s5301_s23 + $0x158] ss:$8 sps:$4 sm:$0xff]  }
  0x78   : > { %1202 = vmatprep.subr.bf16.mxu1 %v4261_v9  ;;  %v1684_v5 = vsel %vm1026_vm4, %v4359_v4, 0  ;;  %v544_v9 = vsub.s32 5, %v5448_v20 }
  0x7a   : > { %1162 = vmatpush2.bf16.msra.mxu0 %v4258_v10  ;;  %v4775_v10 = vld [vmem:[%s5301_s23 + $0x14c] ss:$8 sps:$4 sm:$0xff]  }
  0x7b   : > { %1163 = vmatprep.subr.bf16.mxu0 %v4251_v11  ;;  %1203 = vmatpush2.bf16.msra.mxu1 %v4260_v12  ;;  %v4773_v12 = vld [vmem:[%s5301_s23 + $0x148] ss:$8 sps:$4 sm:$0xff]  }
  0x7c   : > { %1204 = vmatprep.subr.bf16.mxu1 %v4253_v16 }
  0x7e   : > { %1164 = vmatpush2.bf16.msra.mxu0 %v4250_v13  ;;  %v545_v13 = vrot.slane %v5456_v25, %v544_v9 }
  0x7f   : > { %1205 = vmatpush2.bf16.msra.mxu1 %v4252_v17  ;;  %4696 = vmatprep.subr.bf16.mxu0 %v5222_v18  ;;  %v540_v17 = vsub.s32 4, %v5448_v20 }
  0x80   : > { %4690 = vmatprep.subr.bf16.mxu1 %v5222_v18 }
  0x81   : > { %1166 = vmatmul.mubr.bf16.vlgmr.msra.gmra.mxu0 %v5390_v57  ;;  %v541_v22 = vrot.slane %v5456_v25, %v540_v17 }
  0x82   : > { %1207 = vmatmul.mubr.bf16.vlgmr.msra.gmra.mxu1 %v5390_v57  ;;  %4698 = vmatprep.mubr.msk.bf16.mxu0 %vm5223_vm5, %v5222_v18 }
  0x83   : > { %4692 = vmatprep.mubr.msk.bf16.mxu1 %vm5223_vm5, %v5222_v18 }
 0x111   : > { %v1085_v28 = vpop.f32.mrf.mxu0  ;;  %v1126_v31 = vpop.f32.mrf.mxu1 }
 0x112   : > { %v1086_v42 = vadd.f32 %v1085_v28, %v525_v32  ;;  %v1127_v46 = vadd.f32 %v1126_v31, %v533_v38  ;;  %v4782_v38 = vld [vmem:[%s5301_s23 + $0x60] ss:$8 sps:$4 sm:$0xff]  }
 0x113   : > { %v1087_v33 = vpop.f32.mrf.mxu0  ;;  %v1128_v35 = vpop.f32.mrf.mxu1 }
 0x114   : > { %v1088_v34 = vadd.f32 %v1087_v33, %v529_v27  ;;  %v1129_v36 = vadd.f32 %v1128_v35, %v537_v29  ;;  %v1215_v47 = vpack.c.bf16 %v1086_v42, %v1086_v42  ;;  %v1217_v49 = vpack.c.bf16 %v1127_v46, %v1127_v46  ;;  %v4779_v35 = vld [vmem:[%s5301_s23 + $0x70] ss:$8 sps:$4 sm:$0xff]   ;;  %v4788_v42 = vld [vmem:[%s5301_s23 + $0x40] ss:$8 sps:$4 sm:$0xff]  }
 0x115   : > { %v1089_v37 = vpop.f32.mrf.mxu0  ;;  %v1130_v40 = vpop.f32.mrf.mxu1  ;;  %v4794_v46 = vld [vmem:[%s5301_s23 + $0x20] ss:$8 sps:$4 sm:$0xff]  }
 0x116   : > { %v1216_v39 = vpack.c.bf16 %v1088_v34, %v1088_v34  ;;  %v1218_v43 = vpack.c.bf16 %v1129_v36, %v1129_v36  ;;  %v4781_v36 = vld [vmem:[%s5301_s23 + $0x74] ss:$8 sps:$4 sm:$0xff]   ;;  %v4784_v37 = vld [vmem:[%s5301_s23 + $0x64] ss:$8 sps:$4 sm:$0xff]   ;;  %v4785_v40 = vld [vmem:[%s5301_s23 + $0x50] ss:$8 sps:$4 sm:$0xff]  }
 0x117   : > { %v1090_v44 = vpop.f32.mrf.mxu0  ;;  %v1131_v45 = vpop.f32.mrf.mxu1 }
 0x118   : > { %4691 = vmatpush3.bf16.xpose.msra.mxu1 %v1216_v39  ;;  %4697 = vmatpush3.bf16.xpose.msra.mxu0 %v1218_v43  ;;  %v4787_v39 = vld [vmem:[%s5301_s23 + $0x54] ss:$8 sps:$4 sm:$0xff]   ;;  %v4791_v44 = vld [vmem:[%s5301_s23 + $0x30] ss:$8 sps:$4 sm:$0xff]   ;;  %v4796_v45 = vld [vmem:[%s5301_s23 + $0x24] ss:$8 sps:$4 sm:$0xff]  }
 0x119   : > { %1689 = vmatprep.subr.bf16.mxu0 %v4746_v41  ;;  %1434 = vmatprep.subr.bf16.mxu1 %v4781_v36  ;;  %v4790_v41 = vld [vmem:[%s5301_s23 + $0x44] ss:$8 sps:$4 sm:$0xff]   ;;  %v4793_v43 = vld [vmem:[%s5301_s23 + $0x34] ss:$8 sps:$4 sm:$0xff]  }
 0x11f   : > { %4693 = vmatmul.mubr.bf16.vlgmr.msra.gmra.mxu1 %v1215_v47  ;;  %4699 = vmatmul.mubr.bf16.vlgmr.msra.gmra.mxu0 %v1217_v49  ;;  %v4799_v47 = vld [vmem:[%s5301_s23 + $0x14] ss:$8 sps:$4 sm:$0xff]   ;;  %v4802_v49 = vld [vmem:[%s5301_s23 + $0x4] ss:$8 sps:$4 sm:$0xff]  }
 0x120   : > { %4312 = vmatprep.mubr.msk.bf16.mxu1 %vm1022_vm3, %v5350_v55  ;;  %1690 = vmatpush1.bf16.msra.mxu0 %v4744_v48  ;;  %v4797_v48 = vld [vmem:[%s5301_s23 + $0x10] ss:$8 sps:$4 sm:$0xff]  }
 0x121   : > { %4362 = vmatprep.mubr.msk.bf16.mxu0 %vm1022_vm3, %v5350_v55  ;;  %1691 = vmatprep.subr.bf16.mxu0 %v4749_v50  ;;  %v1299_v50 = vld [vmem:[%s5301_s23 + $0xb0] sm:$0x33] }
 0x122   : > { %1435 = vmatpush1.bf16.msra.mxu1 %v4779_v35 }
 0x123   : > { %1436 = vmatprep.subr.bf16.mxu1 %v4784_v37 }
 0x124   : > { %1692 = vmatpush1.bf16.msra.mxu0 %v4747_v51  ;;  %v4800_v51 = vld [vmem:[%s5301_s23] ss:$8 sps:$4 sm:$0xff]  }
 0x125   : > { %1693 = vmatprep.subr.bf16.mxu0 %v4752_v52  ;;  %v4310_v52 = vcombine.high %v1299_v50, %v1299_v50 }
 0x126   : > { %1437 = vmatpush1.bf16.msra.mxu1 %v4782_v38 }
 0x127   : > { %1438 = vmatprep.subr.bf16.mxu1 %v4787_v39 }
 0x128   : > { %1694 = vmatpush1.bf16.msra.mxu0 %v4750_v53  ;;  %v4309_v53 = vcombine.low %v1299_v50, %v1299_v50 }
 0x129   : > { %1695 = vmatprep.subr.bf16.mxu0 %v4755_v54 }
 0x12a   : > { %1439 = vmatpush1.bf16.msra.mxu1 %v4785_v40  ;;  %v1429_v54 = vsel %vm1026_vm4, %v4309_v53, 0 }
 0x12b   : > { %1440 = vmatprep.subr.bf16.mxu1 %v4790_v41 }
 0x12c   : > { %1696 = vmatpush1.bf16.msra.mxu0 %v4753_v56  ;;  %v4807_v56 = vld [vmem:[%s5301_s23 + $0xa4] ss:$8 sps:$4 sm:$0xff]  }
 0x12d   : > { %1697 = vmatprep.subr.bf16.mxu0 %v4758_v58  ;;  %v4805_v58 = vld [vmem:[%s5301_s23 + $0xa0] ss:$8 sps:$4 sm:$0xff]  }
 0x12e   : > { %1441 = vmatpush1.bf16.msra.mxu1 %v4788_v42 }
 0x12f   : > { %1442 = vmatprep.subr.bf16.mxu1 %v4793_v43 }
 0x130   : > { %1698 = vmatpush1.bf16.msra.mxu0 %v4756_v59  ;;  %v4810_v59 = vld [vmem:[%s5301_s23 + $0x94] ss:$8 sps:$4 sm:$0xff]  }
 0x131   : > { %1699 = vmatprep.subr.bf16.mxu0 %v4761_v60  ;;  %v4808_v60 = vld [vmem:[%s5301_s23 + $0x90] ss:$8 sps:$4 sm:$0xff]  }
 0x132   : > { %1443 = vmatpush1.bf16.msra.mxu1 %v4791_v44 }
 0x133   : > { %1444 = vmatprep.subr.bf16.mxu1 %v4796_v45 }
 0x134   : > { %1700 = vmatpush1.bf16.msra.mxu0 %v4759_v61  ;;  %v4813_v61 = vld [vmem:[%s5301_s23 + $0x84] ss:$8 sps:$4 sm:$0xff]  }
 0x135   : > { %1701 = vmatprep.subr.bf16.mxu0 %v4764_v62  ;;  %v4811_v62 = vld [vmem:[%s5301_s23 + $0x80] ss:$8 sps:$4 sm:$0xff]  }
 0x136   : > { %1445 = vmatpush1.bf16.msra.mxu1 %v4794_v46 }
 0x137   : > { %1446 = vmatprep.subr.bf16.mxu1 %v4799_v47 }
 0x138   : > { %1702 = vmatpush1.bf16.msra.mxu0 %v4762_v63 }
 0x139   : > { %1703 = vmatprep.subr.bf16.mxu0 %v4767_v0 }
 0x13a   : > { %1447 = vmatpush1.bf16.msra.mxu1 %v4797_v48 }
 0x13b   : > { %1448 = vmatprep.subr.bf16.mxu1 %v4802_v49 }
 0x13c   : > { %1704 = vmatpush1.bf16.msra.mxu0 %v4765_v2 }
 0x13d   : > { %4361 = vmatprep.subr.msk.bf16.mxu0 %vm1026_vm4, %v4360_v3 }
 0x13e   : > { %1449 = vmatpush1.bf16.msra.mxu1 %v4800_v51 }
 0x13f   : > { %4311 = vmatprep.subr.msk.bf16.mxu1 %vm1026_vm4, %v4310_v52 }
 0x140   : > { %1714 = vmatpush2.bf16.msra.mxu0 %v1684_v5 }
 0x141   : > { %v1167_v8 = vpop.f32.mrf.mxu0  ;;  %1715 = vmatprep.subr.bf16.mxu0 %v4772_v6 }
 0x142   : > { %v1168_v28 = vadd.f32 %v1167_v8, %v541_v22  ;;  %v5513_v31 = vpop.f32.mrf.mxu1  ;;  %1459 = vmatpush2.bf16.msra.mxu1 %v1429_v54  ;;  %v4286_v54 = vld [vmem:[%s5291_s17 + $0x1] ss:$8 sm:$0x3] }
 0x143   : > { %v1169_v11 = vpop.f32.mrf.mxu0  ;;  %1460 = vmatprep.subr.bf16.mxu1 %v4807_v56 }
 0x144   : > { %1716 = vmatpush2.bf16.msra.mxu0 %v4770_v7  ;;  %v1170_v19 = vadd.f32 %v1169_v11, %v545_v13  ;;  %v1219_v29 = vpack.c.bf16 %v1168_v28, %v1168_v28  ;;  %v5515_v32 = vpop.f32.mrf.mxu1 }
 0x145   : > { %v1171_v14 = vpop.f32.mrf.mxu0  ;;  %1717 = vmatprep.subr.bf16.mxu0 %v4775_v10 }
 0x146   : > { %v1220_v27 = vpack.c.bf16 %v1170_v19, %v1170_v19  ;;  %v1212_v33 = vpop.f32.mrf.mxu1  ;;  %1461 = vmatpush2.bf16.msra.mxu1 %v4805_v58  ;;  %v1306_v58 = vrot.slane %v4286_v54, %v5459_v26 }
 0x147   : > { %v1172_v16 = vpop.f32.mrf.mxu0  ;;  %1462 = vmatprep.subr.bf16.mxu1 %v4810_v59  ;;  %v1310_v59 = vrot.slane %v4286_v54, %v5453_v23  ;;  %v4848_v54 = vld [vmem:[%s5301_s23 + $0x1f4] ss:$8 sps:$4 sm:$0xff]  }
 0x148   : > { %1718 = vmatpush2.bf16.msra.mxu0 %v4773_v12  ;;  %v1213_v34 = vpop.f32.mrf.mxu1 }
 0x149   : > { %1719 = vmatprep.subr.bf16.mxu0 %v4778_v15  ;;  %v4336_v15 = vld [vmem:[%s5291_s17 + $0x2] ss:$8 sm:$0x3] }
 0x14a   : > { %1463 = vmatpush2.bf16.msra.mxu1 %v4808_v60  ;;  %v1561_v16 = vrot.slane %v4336_v15, %v5459_v26  ;;  %v1565_v19 = vrot.slane %v4336_v15, %v5453_v23  ;;  %v5224_v60 = vmov 0  }
 0x14b   : > { %1464 = vmatprep.subr.bf16.mxu1 %v4813_v61 }
 0x14c   : > { %1720 = vmatpush2.bf16.msra.mxu0 %v4776_v21 }
 0x14d   : > { %4702 = vmatprep.subr.bf16.mxu0 %v5222_v18 }
 0x14e   : > { %1465 = vmatpush2.bf16.msra.mxu1 %v4811_v62 }
 0x14f   : > { %1722 = vmatmul.mubr.bf16.vlgmr.msra.gmra.mxu0 %v5390_v57 }
 0x150   : > { %4703 = vmatpush3.bf16.xpose.msra.mxu0 %v1220_v27  ;;  %4704 = vmatprep.mubr.msk.bf16.mxu0 %vm5223_vm5, %v5222_v18 }
 0x151   : > { %1467 = vmatmul.mubr.bf16.vlgmr.msra.gmra.mxu1 %v5390_v57 }
 0x152   : > { %1775 = vmatprep.mubr.bf16.mxu1 %v5224_v60 }
 0x157   : > { %4705 = vmatmul.mubr.bf16.vlgmr.msra.gmra.mxu0 %v1219_v29 }
 0x158   : > { %2130 = vmatprep.mubr.bf16.mxu0 %v5224_v60 }
 0x1df   : > { %v1257_v63 = vpop.f32.mrf.mxu1  ;;  %v1512_v0 = vpop.f32.mrf.mxu0 }
 0x1e0   : > { %v1263_v2 = vmul.f32 0.1490712, %v1257_v63  ;;  %v1518_v3 = vmul.f32 0.1490712, %v1512_v0 }
 0x1e1   : > { %v4694_v4 = vpop.f32.mrf.mxu1  ;;  %v4700_v5 = vpop.f32.mrf.mxu0 }
 0x1e2   : > { %v1519_v7 = vadd.f32 %v1518_v3, %v5543_v1  ;;  %v1264_v12 = vadd.f32 %v1263_v2, %v5543_v1 }
 0x1e3   : > { %v1260_v6 = vpop.f32.mrf.mxu1  ;;  %v1515_v8 = vpop.f32.mrf.mxu0 }
 0x1e4   : > { %v1520_v10 = vsel %vm1265_vm6, %v1519_v7, -inf  ;;  %v1266_v14 = vsel %vm1265_vm6, %v1264_v12, -inf }
 0x1e5   : > { %v4695_v11 = vpop.f32.mrf.mxu1  ;;  %1521 = vmax.xlane.f32.xlu0 %v1520_v10  ;;  %v4701_v13 = vpop.f32.mrf.mxu0 }
 0x1e9   : > { %1267 = vmax.xlane.f32.xlu0 %v1266_v14 }
 0x20f   : > { %v1723_v21 = vpop.f32.mrf.mxu0 }
 0x210   : > { %v1724_v22 = vadd.f32 %v1723_v21, %v1561_v16 }
 0x211   : > { %v1725_v27 = vpop.f32.mrf.mxu0  ;;  %v1468_v56 = vpop.f32.mrf.mxu1 }
 0x212   : > { %v1731_v28 = vpack.c.bf16 %v1724_v22, %v1724_v22  ;;  %v1726_v29 = vadd.f32 %v1725_v27, %v1565_v19  ;;  %v1469_v62 = vadd.f32 %v1468_v56, %v1306_v58  ;;  %v4816_v19 = vld [vmem:[%s5301_s23 + $0x1e4] ss:$8 sps:$4 sm:$0xff]   ;;  %v4814_v27 = vld [vmem:[%s5301_s23 + $0x1e0] ss:$8 sps:$4 sm:$0xff]   ;;  %v4846_v56 = vld [vmem:[%s5301_s23 + $0x1f0] ss:$8 sps:$4 sm:$0xff]  }
 0x213   : > { %v1727_v33 = vpop.f32.mrf.mxu0  ;;  %v1470_v61 = vpop.f32.mrf.mxu1 }
 0x214   : > { %v1738_v34 = vsel %vm1736_vm7, %v1731_v28, 0  ;;  %v1732_v35 = vpack.c.bf16 %v1726_v29, %v1726_v29  ;;  %v1471_v63 = vadd.f32 %v1470_v61, %v1310_v59  ;;  %v4819_v29 = vld [vmem:[%s5301_s23 + $0x1d4] ss:$8 sps:$4 sm:$0xff]   ;;  %v4817_v33 = vld [vmem:[%s5301_s23 + $0x1d0] ss:$8 sps:$4 sm:$0xff]  }
 0x215   : > { %v1728_v36 = vpop.f32.mrf.mxu0  ;;  %v1472_v0 = vpop.f32.mrf.mxu1 }
 0x216   : > { %4363 = vmatprep.subr.msk.bf16.mxu1 %vm1736_vm7, %v1732_v35  ;;  %v1477_v2 = vpack.c.bf16 %v1471_v63, %v1471_v63  ;;  %v4820_v35 = vld [vmem:[%s5301_s23 + $0x1c0] ss:$8 sps:$4 sm:$0xff]   ;;  %v4825_v36 = vld [vmem:[%s5301_s23 + $0x1b4] ss:$8 sps:$4 sm:$0xff]  }
 0x217   : > { %v1868_v37 = vpop.f32.mrf.mxu0  ;;  %1758 = vmatpush1.bf16.msra.mxu1 %v1738_v34  ;;  %v1473_v3 = vpop.f32.mrf.mxu1  ;;  %v4822_v34 = vld [vmem:[%s5301_s23 + $0x1c4] ss:$8 sps:$4 sm:$0xff]  }
 0x218   : > { %v1874_v38 = vmul.f32 0.1490712, %v1868_v37  ;;  %4365 = vmatprep.subr.msk.bf16.mxu1 %vm1736_vm7, %v1477_v2  ;;  %v4823_v37 = vld [vmem:[%s5301_s23 + $0x1b0] ss:$8 sps:$4 sm:$0xff]  }
 0x219   : > { %v4706_v39 = vpop.f32.mrf.mxu0 }
 0x21a   : > { %v1875_v40 = vadd.f32 %v1874_v38, %v5543_v1  ;;  %v4828_v38 = vld [vmem:[%s5301_s23 + $0x1a4] ss:$8 sps:$4 sm:$0xff]   ;;  %v4826_v39 = vld [vmem:[%s5301_s23 + $0x1a0] ss:$8 sps:$4 sm:$0xff]  }
 0x21b   : > { %v1871_v41 = vpop.f32.mrf.mxu0 }
 0x21c   : > { %v1876_v42 = vsel %vm1265_vm6, %v1875_v40, -inf  ;;  %v4829_v41 = vld [vmem:[%s5301_s23 + $0x190] ss:$8 sps:$4 sm:$0xff]  }
 0x21d   : > { %1877 = vmax.xlane.f32.xlu0 %v1876_v42  ;;  %v4707_v43 = vpop.f32.mrf.mxu0  ;;  %v4834_v42 = vld [vmem:[%s5301_s23 + $0x184] ss:$8 sps:$4 sm:$0xff]  }
 0x21e   : > { %v4832_v43 = vld [vmem:[%s5301_s23 + $0x180] ss:$8 sps:$4 sm:$0xff]  }
 0x26e   : > { %v1522_v44 = vpop.xlane.xlu0 %1521 }
 0x26f   : > { %v1523_v45 = vsub.f32 %v1519_v7, %v1522_v44  ;;  %v4837_v44 = vld [vmem:[%s5301_s23 + $0x174] ss:$8 sps:$4 sm:$0xff]  }
 0x271   : > { %v1524_v46 = vmul.f32 1.442695, %v1523_v45  ;;  %v4389_v45 = vld [vmem:[%s5301_s23 + $0x220] sm:$0x33] }
 0x272   : > { %v1268_v47 = vpop.xlane.xlu0 %1267 }
 0x273   : > { %5124 = vpow2.f32 %v1524_v46  ;;  %v1269_v48 = vsub.f32 %v1264_v12, %v1268_v47  ;;  %v1476_v12 = vpack.c.bf16 %v1469_v62, %v1469_v62  ;;  %v4835_v46 = vld [vmem:[%s5301_s23 + $0x170] ss:$8 sps:$4 sm:$0xff]   ;;  %v4414_v47 = vcombine.high %v4389_v45, %v4389_v45 }
 0x275   : > { %v1270_v49 = vmul.f32 1.442695, %v1269_v48  ;;  %v1788_v15 = vsel %vm1736_vm7, %v1476_v12, 0  ;;  %v4413_v48 = vcombine.low %v4389_v45, %v4389_v45  ;;  %v4866_v45 = vld [vmem:[%s5301_s23 + $0x24c] ss:$8 sps:$4 sm:$0xff]  }
 0x277   : > { %5126 = vpow2.f32 %v1270_v49  ;;  %v2040_v49 = vsel %vm1026_vm4, %v4413_v48, 0  ;;  %v4867_v48 = vld [vmem:[%s5301_s23 + $0x238] ss:$8 sps:$4 sm:$0xff]  }
 0x280   : > { %v5125_v50 = vpop.eup %5124 }
 0x281   : > { %v1526_v51 = vsel %vm1265_vm6, %v5125_v50, 0.0 }
 0x282   : > { %1527 = vadd.xlane.f32.xlu1 %v1526_v51  ;;  %v4840_v51 = vld [vmem:[%s5301_s23 + $0x210] ss:$8 sps:$4 sm:$0xff]  }
 0x284   : > { %v5127_v52 = vpop.eup %5126 }
 0x285   : > { %v1272_v53 = vsel %vm1265_vm6, %v5127_v52, 0.0 }
 0x286   : > { %1273 = vadd.xlane.f32.xlu1 %v1272_v53  ;;  %v4843_v53 = vld [vmem:[%s5301_s23 + $0x200] ss:$8 sps:$4 sm:$0xff]  }
 0x2a6   : > { %v1878_v4 = vpop.xlane.xlu0 %1877 }
 0x2a7   : > { %v1879_v5 = vsub.f32 %v1875_v40, %v1878_v4  ;;  %v4831_v40 = vld [vmem:[%s5301_s23 + $0x194] ss:$8 sps:$4 sm:$0xff]  }
 0x2a9   : > { %v1880_v6 = vmul.f32 1.442695, %v1879_v5 }
 0x2ab   : > { %5128 = vpow2.f32 %v1880_v6 }
 0x2b8   : > { %v5564_v7 = vpop.eup %5128 }
 0x2b9   : > { %v1882_v8 = vsel %vm1265_vm6, %v5564_v7, 0.0 }
 0x2ba   : > { %1883 = vadd.xlane.f32.xlu1 %v1882_v8  ;;  %v4390_v8 = vld [vmem:[%s5291_s17 + $0x3] ss:$8 sm:$0x3] }
 0x30b   : > { %v1528_v10 = vpop.xlane.xlu1 %1527 }
 0x30c   : > { %5130 = vrcp.f32 %v1528_v10  ;;  %v1917_v10 = vrot.slane %v4390_v8, %v5459_v26 }
 0x30f   : > { %v1274_v11 = vpop.xlane.xlu1 %1273 }
 0x310   : > { %5132 = vrcp.f32 %v1274_v11  ;;  %v552_v11 = vsub.s32 7, %v5448_v20 }
 0x319   : > { %v5131_v13 = vpop.eup %5130 }
 0x31a   : > { %v1530_v14 = vmul.f32 %v5131_v13, %v5125_v50  ;;  %v4842_v50 = vld [vmem:[%s5301_s23 + $0x214] ss:$8 sps:$4 sm:$0xff]  }
 0x31c   : > { %v1730_v16 = vpack.c.bf16 %v1530_v14, %v1530_v14 }
 0x31d   : > { %v5133_v21 = vpop.eup %5132 }
 0x31e   : > { %4364 = vmatmul.mubr.msk.bf16.vlgmr.msra.gmra.mxu1 %vm1265_vm6, %v1730_v16  ;;  %v1276_v22 = vmul.f32 %v5133_v21, %v5127_v52  ;;  %v4845_v52 = vld [vmem:[%s5301_s23 + $0x204] ss:$8 sps:$4 sm:$0xff]  }
 0x31f   : > { %1808 = vmatpush1.bf16.msra.mxu1 %v1788_v15  ;;  %1825 = vmatprep.mubr.bf16.mxu1 %v5224_v60  ;;  %v553_v15 = vrot.slane %v5456_v25, %v552_v11 }
 0x320   : > { %2045 = vmatprep.subr.bf16.mxu1 %v4816_v19  ;;  %v1475_v28 = vpack.c.bf16 %v1276_v22, %v1276_v22 }
 0x326   : > { %4366 = vmatmul.mubr.msk.bf16.vlgmr.msra.gmra.mxu1 %vm1265_vm6, %v1475_v28 }
 0x327   : > { %2046 = vmatpush1.bf16.msra.mxu1 %v4814_v27  ;;  %4416 = vmatprep.mubr.msk.bf16.mxu1 %vm1022_vm3, %v5350_v55  ;;  %v548_v27 = vsub.s32 6, %v5448_v20  ;;  %v5121_v20 = vld [vmem:[%s5311_s13 + $0x280] ss:$8 sps:$4 sm:$0xff]  }
 0x328   : > { %2047 = vmatprep.subr.bf16.mxu1 %v4819_v29 }
 0x32b   : > { %2048 = vmatpush1.bf16.msra.mxu1 %v4817_v33  ;;  %v1211_v33 = vadd.f32 %v5515_v32, %v553_v15 }
 0x32c   : > { %2049 = vmatprep.subr.bf16.mxu1 %v4822_v34 }
 0x32f   : > { %2050 = vmatpush1.bf16.msra.mxu1 %v4820_v35 }
 0x330   : > { %2051 = vmatprep.subr.bf16.mxu1 %v4825_v36  ;;  %v549_v36 = vrot.slane %v5456_v25, %v548_v27  ;;  %v4849_v25 = vld [vmem:[%s5301_s23 + $0x298] ss:$8 sps:$4 sm:$0xff]  }
 0x332   : > { %v1209_v32 = vadd.f32 %v5513_v31, %v549_v36  ;;  %v4855_v31 = vld [vmem:[%s5301_s23 + $0x278] ss:$8 sps:$4 sm:$0xff]  }
 0x333   : > { %2052 = vmatpush1.bf16.msra.mxu1 %v4823_v37 }
 0x334   : > { %2053 = vmatprep.subr.bf16.mxu1 %v4828_v38  ;;  %v1222_v38 = vpack.c.bf16 %v1211_v33, %v1211_v33 }
 0x337   : > { %2054 = vmatpush1.bf16.msra.mxu1 %v4826_v39  ;;  %v4851_v39 = vld [vmem:[%s5301_s23 + $0x29c] ss:$8 sps:$4 sm:$0xff]  }
 0x338   : > { %2055 = vmatprep.subr.bf16.mxu1 %v4831_v40  ;;  %v4854_v40 = vld [vmem:[%s5301_s23 + $0x28c] ss:$8 sps:$4 sm:$0xff]  }
 0x33b   : > { %2056 = vmatpush1.bf16.msra.mxu1 %v4829_v41  ;;  %v4852_v41 = vld [vmem:[%s5301_s23 + $0x288] ss:$8 sps:$4 sm:$0xff]  }
 0x33c   : > { %2057 = vmatprep.subr.bf16.mxu1 %v4834_v42  ;;  %v4860_v42 = vld [vmem:[%s5301_s23 + $0x26c] ss:$8 sps:$4 sm:$0xff]  }
 0x33f   : > { %2058 = vmatpush1.bf16.msra.mxu1 %v4832_v43  ;;  %v4863_v43 = vld [vmem:[%s5301_s23 + $0x25c] ss:$8 sps:$4 sm:$0xff]  }
 0x340   : > { %2059 = vmatprep.subr.bf16.mxu1 %v4837_v44  ;;  %v4861_v44 = vld [vmem:[%s5301_s23 + $0x258] ss:$8 sps:$4 sm:$0xff]  }
 0x343   : > { %2060 = vmatpush1.bf16.msra.mxu1 %v4835_v46  ;;  %v1884_v6 = vpop.xlane.xlu1 %1883  ;;  %v4864_v46 = vld [vmem:[%s5301_s23 + $0x248] ss:$8 sps:$4 sm:$0xff]  }
 0x344   : > { %4415 = vmatprep.subr.msk.bf16.mxu1 %vm1026_vm4, %v4414_v47  ;;  %5134 = vrcp.f32 %v1884_v6  ;;  %v4869_v47 = vld [vmem:[%s5301_s23 + $0x23c] ss:$8 sps:$4 sm:$0xff]  }
 0x347   : > { %2070 = vmatpush2.bf16.msra.mxu1 %v2040_v49  ;;  %v4872_v49 = vld [vmem:[%s5301_s23 + $0x22c] ss:$8 sps:$4 sm:$0xff]  }
 0x348   : > { %2071 = vmatprep.subr.bf16.mxu1 %v4842_v50  ;;  %v4441_v50 = vld [vmem:[%s5301_s23 + $0x2d8] sm:$0x33] }
 0x34b   : > { %2072 = vmatpush2.bf16.msra.mxu1 %v4840_v51  ;;  %v4870_v51 = vld [vmem:[%s5301_s23 + $0x228] ss:$8 sps:$4 sm:$0xff]  }
 0x34c   : > { %2073 = vmatprep.subr.bf16.mxu1 %v4845_v52  ;;  %v4466_v52 = vcombine.high %v4441_v50, %v4441_v50 }
 0x34f   : > { %2074 = vmatpush2.bf16.msra.mxu1 %v4843_v53  ;;  %v4465_v53 = vcombine.low %v4441_v50, %v4441_v50 }
 0x350   : > { %2075 = vmatprep.subr.bf16.mxu1 %v4848_v54 }
 0x351   : > { %v5135_v14 = vpop.eup %5134  ;;  %v2347_v54 = vsel %vm1026_vm4, %v4465_v53, 0 }
 0x352   : > { %v1886_v29 = vmul.f32 %v5135_v14, %v5564_v7  ;;  %v1221_v7 = vpack.c.bf16 %v1209_v32, %v1209_v32 }
 0x353   : > { %2076 = vmatpush2.bf16.msra.mxu1 %v4846_v56  ;;  %v4877_v56 = vld [vmem:[%s5301_s23 + $0x2cc] ss:$8 sps:$4 sm:$0xff]  }
 0x354   : > { %v2086_v37 = vpack.c.bf16 %v1886_v29, %v1886_v29 }
 0x356   : > { %2078 = vmatmul.mubr.bf16.vlgmr.msra.gmra.mxu1 %v5390_v57 }
 0x357   : > { %2437 = vmatprep.mubr.bf16.mxu1 %v5224_v60  ;;  %v1921_v60 = vrot.slane %v4390_v8, %v5453_v23 }
 0x3de   : > { %v1777_v58 = vpop.f32.mrf.mxu1 }
 0x3e0   : > { %v1779_v59 = vpop.f32.mrf.mxu1 }
 0x3e2   : > { %v1781_v61 = vpop.f32.mrf.mxu1 }
 0x3e3   : > { %v4878_v61 = vld [vmem:[%s5301_s23 + $0x2b8] ss:$8 sps:$4 sm:$0xff]  }
 0x3e4   : > { %v1782_v62 = vpop.f32.mrf.mxu1 }
 0x3e5   : > { %v4883_v62 = vld [vmem:[%s5301_s23 + $0x2ac] ss:$8 sps:$4 sm:$0xff]  }
 0x3e6   : > { %v1827_v63 = vpop.f32.mrf.mxu1 }
 0x3e7   : > { %v5601_v0 = vadd.f32 %v1827_v63, %v1777_v58  ;;  %v4875_v58 = vld [vmem:[%s5301_s23 + $0x2c8] ss:$8 sps:$4 sm:$0xff]  }
 0x3e8   : > { %v1829_v2 = vpop.f32.mrf.mxu1  ;;  %v4881_v63 = vld [vmem:[%s5301_s23 + $0x2a8] ss:$8 sps:$4 sm:$0xff]  }
 0x3e9   : > { %v5603_v3 = vadd.f32 %v1829_v2, %v1779_v59  ;;  %v4880_v59 = vld [vmem:[%s5301_s23 + $0x2bc] ss:$8 sps:$4 sm:$0xff]  }
 0x3ea   : > { %v1831_v4 = vpop.f32.mrf.mxu1 }
 0x3ec   : > { %v1832_v5 = vpop.f32.mrf.mxu1 }
 0x416   : > { %v2079_v12 = vpop.f32.mrf.mxu1 }
 0x417   : > { %v2080_v13 = vadd.f32 %v2079_v12, %v1917_v10 }
 0x418   : > { %v2081_v16 = vpop.f32.mrf.mxu1 }
 0x419   : > { %v2087_v19 = vpack.c.bf16 %v2080_v13, %v2080_v13  ;;  %v2082_v21 = vadd.f32 %v2081_v16, %v1921_v60 }
 0x41a   : > { %v2083_v22 = vpop.f32.mrf.mxu1 }
 0x41b   : > { %v2088_v28 = vpack.c.bf16 %v2082_v21, %v2082_v21  ;;  %v2093_v35 = vsel %vm1736_vm7, %v2087_v19, 0  ;;  %v4442_v22 = vld [vmem:[%s5291_s17 + $0x4] ss:$8 sm:$0x3] }
 0x41c   : > { %v2084_v34 = vpop.f32.mrf.mxu1  ;;  %v2228_v29 = vrot.slane %v4442_v22, %v5453_v23 }
 0x41d   : > { %4417 = vmatprep.subr.msk.bf16.mxu0 %vm1736_vm7, %v2088_v28  ;;  %v2224_v28 = vrot.slane %v4442_v22, %v5459_v26 }
 0x41e   : > { %2113 = vmatpush1.bf16.msra.mxu0 %v2093_v35 }
 0x41f   : > { %4708 = vmatprep.subr.bf16.mxu0 %v5222_v18 }
 0x421   : > { %4418 = vmatmul.mubr.msk.bf16.vlgmr.msra.gmra.mxu0 %vm1265_vm6, %v2086_v37 }
 0x422   : > { %4709 = vmatpush3.bf16.xpose.msra.mxu0 %v1222_v38  ;;  %4710 = vmatprep.mubr.msk.bf16.mxu0 %vm5223_vm5, %v5222_v18  ;;  %v4857_v18 = vld [vmem:[%s5301_s23 + $0x27c] ss:$8 sps:$4 sm:$0xff]  }
 0x423   : > { %2352 = vmatprep.subr.bf16.mxu0 %v4851_v39 }
 0x429   : > { %4711 = vmatmul.mubr.bf16.vlgmr.msra.gmra.mxu0 %v1221_v7 }
 0x42a   : > { %4468 = vmatprep.mubr.msk.bf16.mxu0 %vm1022_vm3, %v5350_v55  ;;  %2353 = vmatpush1.bf16.msra.mxu0 %v4849_v25  ;;  %v4858_v55 = vld [vmem:[%s5301_s23 + $0x268] ss:$8 sps:$4 sm:$0xff]  }
 0x42b   : > { %2354 = vmatprep.subr.bf16.mxu0 %v4854_v40 }
 0x42e   : > { %2355 = vmatpush1.bf16.msra.mxu0 %v4852_v41  ;;  %v4471_v41 = vld [vmem:[%s5291_s17 + $0x5] ss:$8 sm:$0x3] }
 0x42f   : > { %2356 = vmatprep.subr.bf16.mxu0 %v4857_v18 }
 0x432   : > { %2357 = vmatpush1.bf16.msra.mxu0 %v4855_v31  ;;  %v2454_v31 = vrot.slane %v4471_v41, %v5459_v26 }
 0x433   : > { %2358 = vmatprep.subr.bf16.mxu0 %v4860_v42 }
 0x436   : > { %2359 = vmatpush1.bf16.msra.mxu0 %v4858_v55  ;;  %v2458_v55 = vrot.slane %v4471_v41, %v5453_v23  ;;  %v2582_v41 = vld [vmem:[%s5306_s26 + $0x210] sm:$0x33] }
 0x437   : > { %2360 = vmatprep.subr.bf16.mxu0 %v4863_v43 }
 0x43a   : > { %2361 = vmatpush1.bf16.msra.mxu0 %v4861_v44 }
 0x43b   : > { %2362 = vmatprep.subr.bf16.mxu0 %v4866_v45 }
 0x43e   : > { %2363 = vmatpush1.bf16.msra.mxu0 %v4864_v46 }
 0x43f   : > { %2364 = vmatprep.subr.bf16.mxu0 %v4869_v47 }
 0x442   : > { %2365 = vmatpush1.bf16.msra.mxu0 %v4867_v48 }
 0x443   : > { %2366 = vmatprep.subr.bf16.mxu0 %v4872_v49  ;;  %v5144_v49 = vld [vmem:[#allocation2 + $0x8] sm:$0xff] }
 0x446   : > { %2367 = vmatpush1.bf16.msra.mxu0 %v4870_v51  ;;  %v5145_v51 = vld [vmem:[#allocation2] sm:$0xff] }
 0x447   : > { %4467 = vmatprep.subr.msk.bf16.mxu0 %vm1026_vm4, %v4466_v52 }
 0x44a   : > { %2377 = vmatpush2.bf16.msra.mxu0 %v2347_v54 }
 0x44b   : > { %2378 = vmatprep.subr.bf16.mxu0 %v4877_v56  ;;  %v4884_v56 = vld [vmem:[%s5306_s26 + $0x150] ss:$24 sps:$4 sm:$0xff]  }
 0x44e   : > { %2379 = vmatpush2.bf16.msra.mxu0 %v4875_v58  ;;  %v4886_v58 = vld [vmem:[%s5306_s26 + $0x154] ss:$24 sps:$4 sm:$0xff]  }
 0x44f   : > { %2380 = vmatprep.subr.bf16.mxu0 %v4880_v59  ;;  %v4887_v59 = vld [vmem:[%s5306_s26 + $0x158] ss:$24 sps:$4 sm:$0xff]  }
 0x452   : > { %2381 = vmatpush2.bf16.msra.mxu0 %v4878_v61  ;;  %v4889_v61 = vld [vmem:[%s5306_s26 + $0x15c] ss:$24 sps:$4 sm:$0xff]  }
 0x453   : > { %2382 = vmatprep.subr.bf16.mxu0 %v4883_v62  ;;  %v4892_v62 = vld [vmem:[%s5306_s26 + $0x124] ss:$24 sps:$4 sm:$0xff]  }
 0x456   : > { %2383 = vmatpush2.bf16.msra.mxu0 %v4881_v63  ;;  %v4895_v63 = vld [vmem:[%s5306_s26 + $0x12c] ss:$24 sps:$4 sm:$0xff]  }
 0x457   : > { %3027 = vmatprep.subr.bf16.mxu0 %v4889_v61  ;;  %v4956_v61 = vld [vmem:[%s5306_s26 + $0x164] ss:$24 sps:$4 sm:$0xff]  }
 0x459   : > { %2385 = vmatmul.mubr.bf16.vlgmr.msra.gmra.mxu0 %v5390_v57 }
 0x45a   : > { %3028 = vmatpush1.bf16.msra.mxu0 %v4887_v59  ;;  %v4951_v59 = vld [vmem:[%s5306_s26 + $0x188] ss:$24 sps:$4 sm:$0xff]  }
 0x45b   : > { %3029 = vmatprep.subr.bf16.mxu0 %v4895_v63 }
 0x4e1   : > { %v2132_v2 = vpop.f32.mrf.mxu0 }
 0x4e2   : > { %v2139_v4 = vadd.f32 %v2132_v2, %v5601_v0  ;;  %v4890_v2 = vld [vmem:[%s5306_s26 + $0x120] ss:$24 sps:$4 sm:$0xff]  }
 0x4e3   : > { %v2134_v5 = vpop.f32.mrf.mxu0 }
 0x4e4   : > { %v2140_v6 = vadd.f32 %v2134_v5, %v5603_v3  ;;  %v4898_v5 = vld [vmem:[%s5306_s26 + $0xf4] ss:$24 sps:$4 sm:$0xff]  }
 0x4e5   : > { %v2136_v8 = vpop.f32.mrf.mxu0 }
 0x4e6   : > { %v4896_v8 = vld [vmem:[%s5306_s26 + $0xf0] ss:$24 sps:$4 sm:$0xff]  }
 0x4e7   : > { %v2137_v10 = vpop.f32.mrf.mxu0 }
 0x4e8   : > { %v4899_v10 = vld [vmem:[%s5306_s26 + $0xf8] ss:$24 sps:$4 sm:$0xff]  }
 0x4e9   : > { %v2175_v11 = vpop.f32.mrf.mxu0 }
 0x4ea   : > { %v2181_v60 = vmul.f32 0.1490712, %v2175_v11  ;;  %v4904_v11 = vld [vmem:[%s5306_s26 + $0xc4] ss:$24 sps:$4 sm:$0xff]  }
 0x4eb   : > { %v4712_v12 = vpop.f32.mrf.mxu0 }
 0x4ec   : > { %v2182_v13 = vadd.f32 %v2181_v60, %v5543_v1  ;;  %v4907_v60 = vld [vmem:[%s5306_s26 + $0xcc] ss:$24 sps:$4 sm:$0xff]   ;;  %v4902_v12 = vld [vmem:[%s5306_s26 + $0xc0] ss:$24 sps:$4 sm:$0xff]  }
 0x4ed   : > { %v2178_v14 = vpop.f32.mrf.mxu0 }
 0x4ee   : > { %v2183_v15 = vsel %vm1265_vm6, %v2182_v13, -inf  ;;  %v4910_v14 = vld [vmem:[%s5306_s26 + $0x94] ss:$24 sps:$4 sm:$0xff]  }
 0x4ef   : > { %2184 = vmax.xlane.f32.xlu0 %v2183_v15  ;;  %v4713_v16 = vpop.f32.mrf.mxu0  ;;  %v4913_v15 = vld [vmem:[%s5306_s26 + $0x9c] ss:$24 sps:$4 sm:$0xff]  }
 0x4f0   : > { %v4908_v16 = vld [vmem:[%s5306_s26 + $0x90] ss:$24 sps:$4 sm:$0xff]  }
 0x519   : > { %v2386_v27 = vpop.f32.mrf.mxu0 }
 0x51a   : > { %v2387_v33 = vadd.f32 %v2386_v27, %v2224_v28 }
 0x51b   : > { %v2388_v1 = vpop.f32.mrf.mxu0 }
 0x51c   : > { %v2389_v34 = vadd.f32 %v2388_v1, %v2228_v29  ;;  %v2394_v36 = vpack.c.bf16 %v2387_v33, %v2387_v33 }
 0x51d   : > { %v2390_v35 = vpop.f32.mrf.mxu0 }
 0x51e   : > { %v2395_v37 = vpack.c.bf16 %v2389_v34, %v2389_v34  ;;  %v2400_v32 = vsel %vm1736_vm7, %v2394_v36, 0  ;;  %v4922_v36 = vld [vmem:[%s5306_s26 + $0x34] ss:$24 sps:$4 sm:$0xff]  }
 0x51f   : > { %v2391_v38 = vpop.f32.mrf.mxu0 }
 0x520   : > { %4469 = vmatprep.subr.msk.bf16.mxu1 %vm1736_vm7, %v2395_v37  ;;  %v4920_v37 = vld [vmem:[%s5306_s26 + $0x30] ss:$24 sps:$4 sm:$0xff]   ;;  %v4925_v38 = vld [vmem:[%s5306_s26 + $0x3c] ss:$24 sps:$4 sm:$0xff]  }
 0x521   : > { %2420 = vmatpush1.bf16.msra.mxu1 %v2400_v32  ;;  %v4923_v32 = vld [vmem:[%s5306_s26 + $0x38] ss:$24 sps:$4 sm:$0xff]  }
 0x522   : > { %2986 = vmatprep.subr.bf16.mxu1 %v4886_v58  ;;  %v4948_v58 = vld [vmem:[%s5306_s26 + $0x180] ss:$24 sps:$4 sm:$0xff]  }
 0x578   : > { %v2185_v57 = vpop.xlane.xlu0 %2184 }
 0x579   : > { %v2186_v19 = vsub.f32 %v2182_v13, %v2185_v57  ;;  %v4905_v13 = vld [vmem:[%s5306_s26 + $0xc8] ss:$24 sps:$4 sm:$0xff]   ;;  %v4911_v57 = vld [vmem:[%s5306_s26 + $0x98] ss:$24 sps:$4 sm:$0xff]  }
 0x57b   : > { %v2187_v21 = vmul.f32 1.442695, %v2186_v19  ;;  %v4916_v19 = vld [vmem:[%s5306_s26 + $0x64] ss:$24 sps:$4 sm:$0xff]  }
 0x57d   : > { %5136 = vpow2.f32 %v2187_v21  ;;  %v4919_v21 = vld [vmem:[%s5306_s26 + $0x6c] ss:$24 sps:$4 sm:$0xff]  }
 0x58a   : > { %v5137_v0 = vpop.eup %5136 }
 0x58b   : > { %v2189_v3 = vsel %vm1265_vm6, %v5137_v0, 0.0 }
 0x58c   : > { %2190 = vadd.xlane.f32.xlu1 %v2189_v3  ;;  %v4917_v3 = vld [vmem:[%s5306_s26 + $0x68] ss:$24 sps:$4 sm:$0xff]  }
 0x615   : > { %v2191_v7 = vpop.xlane.xlu1 %2190 }
 0x616   : > { %5138 = vrcp.f32 %v2191_v7  ;;  %v4926_v7 = vld [vmem:[%s5306_s26] ss:$24 sps:$4 sm:$0xff]  }
 0x623   : > { %v5139_v25 = vpop.eup %5138 }
 0x624   : > { %v2193_v39 = vmul.f32 %v5139_v25, %v5137_v0  ;;  %v4914_v0 = vld [vmem:[%s5306_s26 + $0x60] ss:$24 sps:$4 sm:$0xff]   ;;  %v4928_v25 = vld [vmem:[%s5306_s26 + $0x4] ss:$24 sps:$4 sm:$0xff]  }
 0x626   : > { %v2393_v40 = vpack.c.bf16 %v2193_v39, %v2193_v39  ;;  %v4929_v39 = vld [vmem:[%s5306_s26 + $0x8] ss:$24 sps:$4 sm:$0xff]  }
 0x628   : > { %4470 = vmatmul.mubr.msk.bf16.vlgmr.msra.gmra.mxu1 %vm1265_vm6, %v2393_v40  ;;  %v4931_v40 = vld [vmem:[%s5306_s26 + $0xc] ss:$24 sps:$4 sm:$0xff]  }
 0x629   : > { %2987 = vmatpush1.bf16.msra.mxu1 %v4884_v56  ;;  %v4953_v56 = vld [vmem:[%s5306_s26 + $0x18c] ss:$24 sps:$4 sm:$0xff]  }
 0x62a   : > { %2988 = vmatprep.subr.bf16.mxu1 %v4892_v62  ;;  %v4991_v62 = vld [vmem:[%s5311_s13 + $0x74] ss:$8 sps:$4 sm:$0xff]  }
 0x62d   : > { %2989 = vmatpush1.bf16.msra.mxu1 %v4890_v2 }
 0x62e   : > { %2990 = vmatprep.subr.bf16.mxu1 %v4898_v5  ;;  %v4472_v5 = vld [vmem:[%s5291_s17 + $0x6] ss:$8 sm:$0x3] }
 0x631   : > { %2991 = vmatpush1.bf16.msra.mxu1 %v4896_v8  ;;  %v2496_v8 = vrot.slane %v4472_v5, %v5453_v23 }
 0x632   : > { %2992 = vmatprep.subr.bf16.mxu1 %v4904_v11 }
 0x635   : > { %2993 = vmatpush1.bf16.msra.mxu1 %v4902_v12 }
 0x636   : > { %2994 = vmatprep.subr.bf16.mxu1 %v4910_v14 }
 0x639   : > { %2995 = vmatpush1.bf16.msra.mxu1 %v4908_v16 }
 0x63a   : > { %2996 = vmatprep.subr.bf16.mxu1 %v4916_v19 }
 0x63d   : > { %2997 = vmatpush1.bf16.msra.mxu1 %v4914_v0  ;;  %v4954_v0 = vld [vmem:[%s5306_s26 + $0x160] ss:$24 sps:$4 sm:$0xff]  }
 0x63e   : > { %2998 = vmatprep.subr.bf16.mxu1 %v4922_v36  ;;  %v4965_v36 = vld [vmem:[%s5306_s26 + $0xd4] ss:$24 sps:$4 sm:$0xff]  }
 0x641   : > { %2999 = vmatpush1.bf16.msra.mxu1 %v4920_v37  ;;  %v5001_v37 = vld [vmem:[%s5311_s13 + $0x50] ss:$8 sps:$4 sm:$0xff]  }
 0x642   : > { %3000 = vmatprep.subr.bf16.mxu1 %v4928_v25  ;;  %v5007_v25 = vld [vmem:[%s5311_s13 + $0x40] ss:$8 sps:$4 sm:$0xff]  }
 0x645   : > { %3001 = vmatpush1.bf16.msra.mxu1 %v4926_v7  ;;  %v4968_v7 = vld [vmem:[%s5306_s26 + $0xa4] ss:$24 sps:$4 sm:$0xff]  }
 0x6e8   : > { %v2439_v18 = vpop.f32.mrf.mxu1 }
 0x6e9   : > { %v2446_v42 = vadd.f32 %v2439_v18, %v2139_v4  ;;  %v4893_v4 = vld [vmem:[%s5306_s26 + $0x128] ss:$24 sps:$4 sm:$0xff]   ;;  %v2583_v18 = vld [vmem:[%s5306_s26 + $0x218] sm:$0x33] }
 0x6ea   : > { %v2441_v43 = vpop.f32.mrf.mxu1  ;;  %3030 = vmatpush1.bf16.msra.mxu0 %v4893_v4 }
 0x6eb   : > { %v2447_v44 = vadd.f32 %v2441_v43, %v2140_v6  ;;  %v2461_v45 = vadd.f32 %v2454_v31, %v2446_v42  ;;  %v4901_v6 = vld [vmem:[%s5306_s26 + $0xfc] ss:$24 sps:$4 sm:$0xff]   ;;  %v4543_v31 = vcombine.high %v2582_v41, %v2582_v41  ;;  %v4542_v42 = vcombine.low %v2582_v41, %v2582_v41 }
 0x6ec   : > { %v2443_v46 = vpop.f32.mrf.mxu1  ;;  %3031 = vmatprep.subr.bf16.mxu0 %v4901_v6  ;;  %v4544_v43 = vcombine.low %v2583_v18, %v2583_v18  ;;  %v4473_v6 = vld [vmem:[%s5291_s17 + $0x7] ss:$8 sm:$0x3] }
 0x6ed   : > { %v2462_v47 = vadd.f32 %v2458_v55, %v2447_v44  ;;  %v2463_v52 = vadd.f32 %v5145_v51, %v2461_v45  ;;  %v4545_v55 = vcombine.high %v2583_v18, %v2583_v18  ;;  %4548 = vmatprep.subr.msk.bf16.mxu1 %vm1026_vm4, %v4543_v31  ;;  %v2969_v44 = vsel %vm1026_vm4, %v4542_v42, 0  ;;  %v4938_v45 = vld [vmem:[%s5306_s26 + $0x1e4] ss:$24 sps:$4 sm:$0xff]   ;;  %v4971_v41 = vld [vmem:[%s5306_s26 + $0x74] ss:$24 sps:$4 sm:$0xff]  }
 0x6ee   : > { %v2444_v48 = vpop.f32.mrf.mxu1  ;;  %3032 = vmatpush1.bf16.msra.mxu0 %v4899_v10  ;;  %v2975_v46 = vsel %vm1026_vm4, %v4544_v43, 0  ;;  %3011 = vmatpush2.bf16.msra.mxu1 %v2969_v44  ;;  %v4947_v51 = vld [vmem:[%s5306_s26 + $0x1bc] ss:$24 sps:$4 sm:$0xff]   ;;  %v2492_v10 = vrot.slane %v4472_v5, %v5459_v26  ;;  %v2509_v12 = vrot.slane %v4473_v6, %v5453_v23  ;;  %v2505_v14 = vrot.slane %v4473_v6, %v5459_v26  ;;  %v5013_v18 = vld [vmem:[%s5311_s13 + $0x30] ss:$8 sps:$4 sm:$0xff]  }
 0x6ef   : > { %v2464_v50 = vadd.f32 %v5144_v49, %v2462_v47  ;;  %3033 = vmatprep.subr.bf16.mxu0 %v4907_v60  ;;  %v4941_v47 = vld [vmem:[%s5306_s26 + $0x1ec] ss:$24 sps:$4 sm:$0xff]   ;;  %v4936_v48 = vld [vmem:[%s5306_s26 + $0x1e0] ss:$24 sps:$4 sm:$0xff]   ;;  %3012 = vmatprep.subr.bf16.mxu1 %v4938_v45  ;;  %v4969_v42 = vld [vmem:[%s5306_s26 + $0x70] ss:$24 sps:$4 sm:$0xff]  }
 0x6f0   : > { %v4939_v49 = vld [vmem:[%s5306_s26 + $0x1e8] ss:$24 sps:$4 sm:$0xff]   ;;  %v5021_v31 = vld [vmem:[%s5311_s13 + $0x24] ss:$8 sps:$4 sm:$0xff]   ;;  %v5027_v44 = vld [vmem:[%s5311_s13 + $0x14] ss:$8 sps:$4 sm:$0xff]  }
 0x6f1   : > { %v2469_v53 = vsel %vm1022_vm3, %v2464_v50, 0.0  ;;  %v5019_v43 = vld [vmem:[%s5311_s13 + $0x20] ss:$8 sps:$4 sm:$0xff]   ;;  %v4988_v6 = vld [vmem:[%s5306_s26 + $0x194] ss:$24 sps:$4 sm:$0xff]  }
 0x6f2   : > { %v2470_v54 = vadd.f32 %v2469_v53, %v2463_v52  ;;  %3034 = vmatpush1.bf16.msra.mxu0 %v4905_v13  ;;  %3013 = vmatpush2.bf16.msra.mxu1 %v4936_v48  ;;  %v4945_v53 = vld [vmem:[%s5306_s26 + $0x1b8] ss:$24 sps:$4 sm:$0xff]   ;;  %v2584_v48 = vld [vmem:[%s5306_s26 + $0x220] sm:$0x33] }
 0x6f3   : > { %3035 = vmatprep.subr.bf16.mxu0 %v4913_v15  ;;  %v4972_v45 = vld [vmem:[%s5306_s26 + $0x40] ss:$24 sps:$4 sm:$0xff]  }
 0x6f4   : > { %2471 = vadd.xlane.f32.xlu0 %v2470_v54  ;;  %v4950_v54 = vld [vmem:[%s5306_s26 + $0x184] ss:$24 sps:$4 sm:$0xff]   ;;  %v4983_v5 = vld [vmem:[%s5306_s26 + $0x1c0] ss:$24 sps:$4 sm:$0xff]  }
 0x6f6   : > { %3036 = vmatpush1.bf16.msra.mxu0 %v4911_v57 }
 0x6f7   : > { %3037 = vmatprep.subr.bf16.mxu0 %v4919_v21 }
 0x6fa   : > { %3038 = vmatpush1.bf16.msra.mxu0 %v4917_v3 }
 0x6fb   : > { %3039 = vmatprep.subr.bf16.mxu0 %v4925_v38  ;;  %v5009_v38 = vld [vmem:[%s5311_s13 + $0x44] ss:$8 sps:$4 sm:$0xff]  }
 0x6fe   : > { %3040 = vmatpush1.bf16.msra.mxu0 %v4923_v32  ;;  %v4963_v32 = vld [vmem:[%s5306_s26 + $0xd0] ss:$24 sps:$4 sm:$0xff]  }
 0x6ff   : > { %3041 = vmatprep.subr.bf16.mxu0 %v4931_v40  ;;  %v4966_v40 = vld [vmem:[%s5306_s26 + $0xa0] ss:$24 sps:$4 sm:$0xff]  }
 0x702   : > { %3042 = vmatpush1.bf16.msra.mxu0 %v4929_v39  ;;  %v5015_v39 = vld [vmem:[%s5311_s13 + $0x34] ss:$8 sps:$4 sm:$0xff]  }
 0x703   : > { %4550 = vmatprep.subr.msk.bf16.mxu0 %vm1026_vm4, %v4545_v55  ;;  %v4974_v55 = vld [vmem:[%s5306_s26 + $0x44] ss:$24 sps:$4 sm:$0xff]  }
 0x706   : > { %3052 = vmatpush2.bf16.msra.mxu0 %v2975_v46  ;;  %v4977_v46 = vld [vmem:[%s5306_s26 + $0x14] ss:$24 sps:$4 sm:$0xff]  }
 0x707   : > { %3053 = vmatprep.subr.bf16.mxu0 %v4941_v47  ;;  %v5025_v47 = vld [vmem:[%s5311_s13 + $0x10] ss:$8 sps:$4 sm:$0xff]  }
 0x70a   : > { %3054 = vmatpush2.bf16.msra.mxu0 %v4939_v49  ;;  %v5033_v49 = vld [vmem:[%s5311_s13 + $0x4] ss:$8 sps:$4 sm:$0xff]  }
 0x70b   : > { %3055 = vmatprep.subr.bf16.mxu0 %v4947_v51  ;;  %v4547_v51 = vcombine.high %v2584_v48, %v2584_v48 }
 0x70e   : > { %3056 = vmatpush2.bf16.msra.mxu0 %v4945_v53  ;;  %v5031_v53 = vld [vmem:[%s5311_s13] ss:$8 sps:$4 sm:$0xff]  }
 0x70f   : > { %3057 = vmatprep.subr.bf16.mxu0 %v4953_v56 }
 0x712   : > { %3058 = vmatpush2.bf16.msra.mxu0 %v4951_v59  ;;  %v5037_v59 = vld [vmem:[%s5311_s13 + $0xf0] ss:$8 sps:$4 sm:$0xff]  }
 0x713   : > { %3678 = vmatprep.subr.bf16.mxu0 %v4991_v62  ;;  %v4980_v62 = vld [vmem:[%s5306_s26 + $0x1f0] ss:$24 sps:$4 sm:$0xff]  }
 0x77d   : > { %v2472_v22 = vpop.xlane.xlu0 %2471 }
 0x77e   : > { %v2474_v27 = vmul.f32 0.0055555557, %v2472_v22  ;;  %v4959_v22 = vld [vmem:[%s5306_s26 + $0x134] ss:$24 sps:$4 sm:$0xff]  }
 0x780   : > { %v5688_v28 = vsub.f32 %v2463_v52, %v2474_v27  ;;  %v5690_v29 = vsub.f32 %v2464_v50, %v2474_v27  ;;  %v4944_v50 = vld [vmem:[%s5306_s26 + $0x1b4] ss:$24 sps:$4 sm:$0xff]   ;;  %v4942_v52 = vld [vmem:[%s5306_s26 + $0x1b0] ss:$24 sps:$4 sm:$0xff]  }
 0x781   : > { %3014 = vmatprep.subr.bf16.mxu1 %v4944_v50  ;;  %v4989_v27 = vld [vmem:[%s5311_s13 + $0x70] ss:$8 sps:$4 sm:$0xff]  }
 0x782   : > { %v2477_v1 = vmul.f32 %v5688_v28, %v5688_v28  ;;  %v2478_v33 = vmul.f32 %v5690_v29, %v5690_v29  ;;  %3015 = vmatpush2.bf16.msra.mxu1 %v4942_v52  ;;  %v4975_v50 = vld [vmem:[%s5306_s26 + $0x10] ss:$24 sps:$4 sm:$0xff]   ;;  %v4546_v52 = vcombine.low %v2584_v48, %v2584_v48 }
 0x783   : > { %3016 = vmatprep.subr.bf16.mxu1 %v4950_v54  ;;  %v5039_v54 = vld [vmem:[%s5311_s13 + $0xf4] ss:$8 sps:$4 sm:$0xff]   ;;  %v5064_v48 = vld [vmem:[%s5311_s13 + $0x1b0] ss:$8 sps:$4 sm:$0xff]  }
 0x784   : > { %v2479_v34 = vsel %vm1022_vm3, %v2478_v33, 0.0  ;;  %v4995_v33 = vld [vmem:[%s5311_s13 + $0x60] ss:$8 sps:$4 sm:$0xff]   ;;  %v2981_v56 = vsel %vm1026_vm4, %v4546_v52, 0  ;;  %v5076_v52 = vld [vmem:[%s5311_s13 + $0x190] ss:$8 sps:$4 sm:$0xff]  }
 0x785   : > { %v2480_v35 = vadd.f32 %v2479_v34, %v2477_v1  ;;  %v4962_v1 = vld [vmem:[%s5306_s26 + $0x104] ss:$24 sps:$4 sm:$0xff]  }
 0x786   : > { %3017 = vmatpush2.bf16.msra.mxu1 %v4948_v58  ;;  %v5003_v34 = vld [vmem:[%s5311_s13 + $0x54] ss:$8 sps:$4 sm:$0xff]  }
 0x787   : > { %2481 = vadd.xlane.f32.xlu1 %v2480_v35  ;;  %3068 = vmatprep.subr.bf16.mxu1 %v4956_v61  ;;  %v4960_v35 = vld [vmem:[%s5306_s26 + $0x100] ss:$24 sps:$4 sm:$0xff]   ;;  %v4982_v58 = vld [vmem:[%s5306_s26 + $0x1f4] ss:$24 sps:$4 sm:$0xff]  }
 0x788   : > { %v5045_v61 = vld [vmem:[%s5311_s13 + $0xe4] ss:$8 sps:$4 sm:$0xff]  }
 0x810   : > { %v2482_v63 = vpop.xlane.xlu1 %2481 }
 0x811   : > { %v2483_v2 = vmul.f32 0.0055555557, %v2482_v63  ;;  %v4985_v63 = vld [vmem:[%s5306_s26 + $0x1c4] ss:$24 sps:$4 sm:$0xff]  }
 0x813   : > { %v2484_v4 = vadd.f32 1e-05, %v2483_v2  ;;  %v5043_v2 = vld [vmem:[%s5311_s13 + $0xe0] ss:$8 sps:$4 sm:$0xff]  }
 0x815   : > { %5140 = vrsqrt.f32 %v2484_v4  ;;  %v5051_v4 = vld [vmem:[%s5311_s13 + $0xd4] ss:$8 sps:$4 sm:$0xff]  }
 0x822   : > { %v5141_v11 = vpop.eup %5140 }
 0x823   : > { %v2487_v60 = vmul.f32 %v5141_v11, %v5690_v29  ;;  %v2486_v13 = vmul.f32 %v5141_v11, %v5688_v28  ;;  %v4997_v28 = vld [vmem:[%s5311_s13 + $0x64] ss:$8 sps:$4 sm:$0xff]   ;;  %v4957_v29 = vld [vmem:[%s5306_s26 + $0x130] ss:$24 sps:$4 sm:$0xff]  }
 0x824   : > { %v4986_v11 = vld [vmem:[%s5306_s26 + $0x190] ss:$24 sps:$4 sm:$0xff]  }
 0x825   : > { %v2500_v15 = vmul.f32 %v2496_v8, %v2487_v60  ;;  %v2499_v16 = vmul.f32 %v2492_v10, %v2486_v13  ;;  %v5049_v8 = vld [vmem:[%s5311_s13 + $0xd0] ss:$8 sps:$4 sm:$0xff]   ;;  %v5057_v10 = vld [vmem:[%s5311_s13 + $0xc4] ss:$8 sps:$4 sm:$0xff]   ;;  %v4994_v60 = vld [vmem:[%s5311_s13 + $0x174] ss:$8 sps:$4 sm:$0xff]  }
 0x826   : > { %v5063_v13 = vld [vmem:[%s5311_s13 + $0xb4] ss:$8 sps:$4 sm:$0xff]  }
 0x827   : > { %v5733_v57 = vadd.f32 %v2509_v12, %v2500_v15  ;;  %v5735_v19 = vadd.f32 %v2505_v14, %v2499_v16  ;;  %v5055_v12 = vld [vmem:[%s5311_s13 + $0xc0] ss:$8 sps:$4 sm:$0xff]   ;;  %v4992_v14 = vld [vmem:[%s5311_s13 + $0x170] ss:$8 sps:$4 sm:$0xff]   ;;  %v5000_v15 = vld [vmem:[%s5311_s13 + $0x164] ss:$8 sps:$4 sm:$0xff]  }
 0x828   : > { %v5061_v16 = vld [vmem:[%s5311_s13 + $0xb0] ss:$8 sps:$4 sm:$0xff]  }
 0x829   : > { %v2515_v21 = vpack.c.bf16 %v5733_v57, %v5733_v57  ;;  %v5742_v3 = vpack.c.bf16 %v5735_v19, %v5735_v19 }
 0x82b   : > { %4549 = vmatprep.mubr.msk.bf16.mxu1 %vm1022_vm3, %v2515_v21  ;;  %4551 = vmatprep.mubr.msk.bf16.mxu0 %vm1022_vm3, %v2515_v21 }
 0x82c   : > { %3019 = vmatmul.mubr.bf16.vlgmr.msra.gmra.mxu1 %v5742_v3  ;;  %3060 = vmatmul.mubr.bf16.vlgmr.msra.gmra.mxu0 %v5742_v3 }
 0x82d   : > { %3069 = vmatpush1.bf16.msra.mxu1 %v4954_v0  ;;  %4553 = vmatprep.mubr.msk.bf16.mxu1 %vm1022_vm3, %v2515_v21  ;;  %v5069_v21 = vld [vmem:[%s5311_s13 + $0xa4] ss:$8 sps:$4 sm:$0xff]   ;;  %v4998_v0 = vld [vmem:[%s5311_s13 + $0x160] ss:$8 sps:$4 sm:$0xff]  }
 0x82e   : > { %3070 = vmatprep.subr.bf16.mxu1 %v4959_v22  ;;  %3679 = vmatpush1.bf16.msra.mxu0 %v4989_v27  ;;  %v5006_v22 = vld [vmem:[%s5311_s13 + $0x154] ss:$8 sps:$4 sm:$0xff]   ;;  %v5067_v27 = vld [vmem:[%s5311_s13 + $0xa0] ss:$8 sps:$4 sm:$0xff]  }
 0x82f   : > { %3680 = vmatprep.subr.bf16.mxu0 %v4997_v28  ;;  %v5004_v28 = vld [vmem:[%s5311_s13 + $0x150] ss:$8 sps:$4 sm:$0xff]  }
 0x831   : > { %3071 = vmatpush1.bf16.msra.mxu1 %v4957_v29  ;;  %v5012_v29 = vld [vmem:[%s5311_s13 + $0x144] ss:$8 sps:$4 sm:$0xff]  }
 0x832   : > { %3072 = vmatprep.subr.bf16.mxu1 %v4962_v1  ;;  %3681 = vmatpush1.bf16.msra.mxu0 %v4995_v33  ;;  %v5018_v1 = vld [vmem:[%s5311_s13 + $0x134] ss:$8 sps:$4 sm:$0xff]   ;;  %v5016_v33 = vld [vmem:[%s5311_s13 + $0x130] ss:$8 sps:$4 sm:$0xff]  }
 0x833   : > { %3682 = vmatprep.subr.bf16.mxu0 %v5003_v34  ;;  %v5024_v34 = vld [vmem:[%s5311_s13 + $0x124] ss:$8 sps:$4 sm:$0xff]  }
 0x835   : > { %3073 = vmatpush1.bf16.msra.mxu1 %v4960_v35  ;;  %v5075_v35 = vld [vmem:[%s5311_s13 + $0x94] ss:$8 sps:$4 sm:$0xff]  }
 0x836   : > { %3074 = vmatprep.subr.bf16.mxu1 %v4965_v36  ;;  %3683 = vmatpush1.bf16.msra.mxu0 %v5001_v37  ;;  %v5022_v36 = vld [vmem:[%s5311_s13 + $0x120] ss:$8 sps:$4 sm:$0xff]   ;;  %v5073_v37 = vld [vmem:[%s5311_s13 + $0x90] ss:$8 sps:$4 sm:$0xff]  }
 0x837   : > { %3684 = vmatprep.subr.bf16.mxu0 %v5009_v38  ;;  %v5030_v38 = vld [vmem:[%s5311_s13 + $0x114] ss:$8 sps:$4 sm:$0xff]  }
 0x839   : > { %3075 = vmatpush1.bf16.msra.mxu1 %v4963_v32  ;;  %v5081_v32 = vld [vmem:[%s5311_s13 + $0x84] ss:$8 sps:$4 sm:$0xff]  }
 0x83a   : > { %3076 = vmatprep.subr.bf16.mxu1 %v4968_v7  ;;  %3685 = vmatpush1.bf16.msra.mxu0 %v5007_v25  ;;  %v5028_v7 = vld [vmem:[%s5311_s13 + $0x110] ss:$8 sps:$4 sm:$0xff]   ;;  %v5079_v25 = vld [vmem:[%s5311_s13 + $0x80] ss:$8 sps:$4 sm:$0xff]  }
 0x83b   : > { %3686 = vmatprep.subr.bf16.mxu0 %v5015_v39  ;;  %v5036_v39 = vld [vmem:[%s5311_s13 + $0x104] ss:$8 sps:$4 sm:$0xff]  }
 0x83d   : > { %3077 = vmatpush1.bf16.msra.mxu1 %v4966_v40  ;;  %v5087_v40 = vld [vmem:[%s5311_s13 + $0x274] ss:$8 sps:$4 sm:$0xff]  }
 0x83e   : > { %3078 = vmatprep.subr.bf16.mxu1 %v4971_v41  ;;  %3687 = vmatpush1.bf16.msra.mxu0 %v5013_v18  ;;  %v5034_v41 = vld [vmem:[%s5311_s13 + $0x100] ss:$8 sps:$4 sm:$0xff]   ;;  %v5042_v18 = vld [vmem:[%s5311_s13 + $0x1f4] ss:$8 sps:$4 sm:$0xff]  }
 0x83f   : > { %3688 = vmatprep.subr.bf16.mxu0 %v5021_v31  ;;  %v5040_v31 = vld [vmem:[%s5311_s13 + $0x1f0] ss:$8 sps:$4 sm:$0xff]  }
 0x841   : > { %3079 = vmatpush1.bf16.msra.mxu1 %v4969_v42  ;;  %v5048_v42 = vld [vmem:[%s5311_s13 + $0x1e4] ss:$8 sps:$4 sm:$0xff]  }
 0x842   : > { %3080 = vmatprep.subr.bf16.mxu1 %v4974_v55  ;;  %3689 = vmatpush1.bf16.msra.mxu0 %v5019_v43  ;;  %v5046_v55 = vld [vmem:[%s5311_s13 + $0x1e0] ss:$8 sps:$4 sm:$0xff]   ;;  %v5054_v43 = vld [vmem:[%s5311_s13 + $0x1d4] ss:$8 sps:$4 sm:$0xff]  }
 0x843   : > { %3690 = vmatprep.subr.bf16.mxu0 %v5027_v44  ;;  %v5052_v44 = vld [vmem:[%s5311_s13 + $0x1d0] ss:$8 sps:$4 sm:$0xff]  }
 0x845   : > { %3081 = vmatpush1.bf16.msra.mxu1 %v4972_v45  ;;  %v5060_v45 = vld [vmem:[%s5311_s13 + $0x1c4] ss:$8 sps:$4 sm:$0xff]  }
 0x846   : > { %3082 = vmatprep.subr.bf16.mxu1 %v4977_v46  ;;  %3691 = vmatpush1.bf16.msra.mxu0 %v5025_v47  ;;  %v5058_v46 = vld [vmem:[%s5311_s13 + $0x1c0] ss:$8 sps:$4 sm:$0xff]   ;;  %v5066_v47 = vld [vmem:[%s5311_s13 + $0x1b4] ss:$8 sps:$4 sm:$0xff]  }
 0x847   : > { %3692 = vmatprep.subr.bf16.mxu0 %v5033_v49  ;;  %v5072_v49 = vld [vmem:[%s5311_s13 + $0x1a4] ss:$8 sps:$4 sm:$0xff]  }
 0x849   : > { %3083 = vmatpush1.bf16.msra.mxu1 %v4975_v50  ;;  %v5070_v50 = vld [vmem:[%s5311_s13 + $0x1a0] ss:$8 sps:$4 sm:$0xff]  }
 0x84a   : > { %4552 = vmatprep.subr.msk.bf16.mxu1 %vm1026_vm4, %v4547_v51  ;;  %3693 = vmatpush1.bf16.msra.mxu0 %v5031_v53  ;;  %v5078_v51 = vld [vmem:[%s5311_s13 + $0x194] ss:$8 sps:$4 sm:$0xff]   ;;  %v5084_v53 = vld [vmem:[%s5311_s13 + $0x184] ss:$8 sps:$4 sm:$0xff]  }
 0x84b   : > { %3694 = vmatprep.subr.bf16.mxu0 %v5039_v54  ;;  %v5082_v54 = vld [vmem:[%s5311_s13 + $0x180] ss:$8 sps:$4 sm:$0xff]  }
 0x84d   : > { %3093 = vmatpush2.bf16.msra.mxu1 %v2981_v56  ;;  %v4474_v56 = vld [vmem:[%s5291_s17 + $0x40] ss:$8 sm:$0xf] }
 0x84e   : > { %3094 = vmatprep.subr.bf16.mxu1 %v4982_v58  ;;  %3695 = vmatpush2.bf16.msra.mxu0 %v5037_v59  ;;  %v4475_v58 = vld [vmem:[%s5291_s17 + $0x40] ss:$8 sm:$0x30] }
 0x84f   : > { %3696 = vmatprep.subr.bf16.mxu0 %v5045_v61  ;;  %v5839_v59 = vor.u32 %v4475_v58, %v4474_v56  ;;  %v5123_v56 = vld [vmem:[%s5311_s13 + $0x284] ss:$8 sps:$4 sm:$0xff]  }
 0x851   : > { %3095 = vmatpush2.bf16.msra.mxu1 %v4980_v62  ;;  %v2593_v61 = vrot.slane %v5839_v59, %v5459_v26  ;;  %v2601_v62 = vrot.slane %v5839_v59, %v532_v30 }
 0x852   : > { %3096 = vmatprep.subr.bf16.mxu1 %v4985_v63  ;;  %3697 = vmatpush2.bf16.msra.mxu0 %v5043_v2  ;;  %v2597_v63 = vrot.slane %v5839_v59, %v5453_v23  ;;  %v2605_v2 = vrot.slane %v5839_v59, %v536_v24 }
 0x853   : > { %3698 = vmatprep.subr.bf16.mxu0 %v5051_v4 }
 0x855   : > { %3097 = vmatpush2.bf16.msra.mxu1 %v4983_v5 }
 0x856   : > { %3098 = vmatprep.subr.bf16.mxu1 %v4988_v6  ;;  %3699 = vmatpush2.bf16.msra.mxu0 %v5049_v8 }
 0x857   : > { %3700 = vmatprep.subr.bf16.mxu0 %v5057_v10 }
 0x859   : > { %3099 = vmatpush2.bf16.msra.mxu1 %v4986_v11 }
 0x85a   : > { %3719 = vmatprep.subr.bf16.mxu1 %v4994_v60  ;;  %3701 = vmatpush2.bf16.msra.mxu0 %v5055_v12 }
 0x85b   : > { %3702 = vmatprep.subr.bf16.mxu0 %v5063_v13 }
 0x85c   : > { %3101 = vmatmul.mubr.bf16.vlgmr.msra.gmra.mxu1 %v5742_v3  ;;  %v5010_v3 = vld [vmem:[%s5311_s13 + $0x140] ss:$8 sps:$4 sm:$0xff]  }
 0x85d   : > { %3720 = vmatpush1.bf16.msra.mxu1 %v4992_v14 }
 0x85e   : > { %3721 = vmatprep.subr.bf16.mxu1 %v5000_v15  ;;  %3703 = vmatpush2.bf16.msra.mxu0 %v5061_v16 }
 0x85f   : > { %3704 = vmatprep.subr.bf16.mxu0 %v5069_v21 }
 0x861   : > { %3722 = vmatpush1.bf16.msra.mxu1 %v4998_v0 }
 0x862   : > { %3723 = vmatprep.subr.bf16.mxu1 %v5006_v22  ;;  %3705 = vmatpush2.bf16.msra.mxu0 %v5067_v27 }
 0x863   : > { %3706 = vmatprep.subr.bf16.mxu0 %v5075_v35  ;;  %v5091_v35 = vld [vmem:[%s5311_s13 + $0x250] ss:$8 sps:$4 sm:$0xff]  }
 0x865   : > { %3724 = vmatpush1.bf16.msra.mxu1 %v5004_v28  ;;  %v5085_v28 = vld [vmem:[%s5311_s13 + $0x270] ss:$8 sps:$4 sm:$0xff]  }
 0x866   : > { %3725 = vmatprep.subr.bf16.mxu1 %v5012_v29  ;;  %3707 = vmatpush2.bf16.msra.mxu0 %v5073_v37  ;;  %v5094_v37 = vld [vmem:[%s5311_s13 + $0x240] ss:$8 sps:$4 sm:$0xff]  }
 0x867   : > { %3708 = vmatprep.subr.bf16.mxu0 %v5081_v32  ;;  %v5097_v32 = vld [vmem:[%s5311_s13 + $0x230] ss:$8 sps:$4 sm:$0xff]  }
 0x869   : > { %3726 = vmatpush1.bf16.msra.mxu1 %v5010_v3 }
 0x86a   : > { %3727 = vmatprep.subr.bf16.mxu1 %v5018_v1  ;;  %3709 = vmatpush2.bf16.msra.mxu0 %v5079_v25  ;;  %v5090_v1 = vld [vmem:[%s5311_s13 + $0x264] ss:$8 sps:$4 sm:$0xff]   ;;  %v5100_v25 = vld [vmem:[%s5311_s13 + $0x220] ss:$8 sps:$4 sm:$0xff]  }
 0x86b   : > { %3760 = vmatprep.subr.bf16.mxu0 %v5087_v40  ;;  %v5103_v40 = vld [vmem:[%s5311_s13 + $0x210] ss:$8 sps:$4 sm:$0xff]  }
 0x86d   : > { %3728 = vmatpush1.bf16.msra.mxu1 %v5016_v33  ;;  %v5088_v33 = vld [vmem:[%s5311_s13 + $0x260] ss:$8 sps:$4 sm:$0xff]  }
 0x86e   : > { %3729 = vmatprep.subr.bf16.mxu1 %v5024_v34  ;;  %v5093_v34 = vld [vmem:[%s5311_s13 + $0x254] ss:$8 sps:$4 sm:$0xff]  }
 0x871   : > { %3730 = vmatpush1.bf16.msra.mxu1 %v5022_v36  ;;  %v5096_v36 = vld [vmem:[%s5311_s13 + $0x244] ss:$8 sps:$4 sm:$0xff]  }
 0x872   : > { %3731 = vmatprep.subr.bf16.mxu1 %v5030_v38  ;;  %v5099_v38 = vld [vmem:[%s5311_s13 + $0x234] ss:$8 sps:$4 sm:$0xff]  }
 0x875   : > { %3732 = vmatpush1.bf16.msra.mxu1 %v5028_v7  ;;  %v5102_v7 = vld [vmem:[%s5311_s13 + $0x224] ss:$8 sps:$4 sm:$0xff]  }
 0x876   : > { %3733 = vmatprep.subr.bf16.mxu1 %v5036_v39  ;;  %v5105_v39 = vld [vmem:[%s5311_s13 + $0x214] ss:$8 sps:$4 sm:$0xff]  }
 0x879   : > { %3734 = vmatpush1.bf16.msra.mxu1 %v5034_v41  ;;  %v5108_v41 = vld [vmem:[%s5311_s13 + $0x204] ss:$8 sps:$4 sm:$0xff]  }
 0x87a   : > { %3735 = vmatprep.subr.bf16.mxu1 %v5042_v18  ;;  %v5106_v18 = vld [vmem:[%s5311_s13 + $0x200] ss:$8 sps:$4 sm:$0xff]  }
 0x87d   : > { %3736 = vmatpush2.bf16.msra.mxu1 %v5040_v31  ;;  %v5111_v31 = vld [vmem:[%s5311_s13 + $0x2c4] ss:$8 sps:$4 sm:$0xff]  }
 0x87e   : > { %3737 = vmatprep.subr.bf16.mxu1 %v5048_v42  ;;  %v5109_v42 = vld [vmem:[%s5311_s13 + $0x2c0] ss:$8 sps:$4 sm:$0xff]  }
 0x881   : > { %3738 = vmatpush2.bf16.msra.mxu1 %v5046_v55  ;;  %v5114_v55 = vld [vmem:[%s5311_s13 + $0x2b4] ss:$8 sps:$4 sm:$0xff]  }
 0x882   : > { %3739 = vmatprep.subr.bf16.mxu1 %v5054_v43  ;;  %v5112_v43 = vld [vmem:[%s5311_s13 + $0x2b0] ss:$8 sps:$4 sm:$0xff]  }
 0x885   : > { %3740 = vmatpush2.bf16.msra.mxu1 %v5052_v44  ;;  %v5117_v44 = vld [vmem:[%s5311_s13 + $0x2a4] ss:$8 sps:$4 sm:$0xff]  }
 0x886   : > { %3741 = vmatprep.subr.bf16.mxu1 %v5060_v45  ;;  %v2613_v45 = vrot.slane %v5839_v59, %v544_v9 }
 0x889   : > { %3742 = vmatpush2.bf16.msra.mxu1 %v5058_v46  ;;  %v5115_v46 = vld [vmem:[%s5311_s13 + $0x2a0] ss:$8 sps:$4 sm:$0xff]  }
 0x88a   : > { %3743 = vmatprep.subr.bf16.mxu1 %v5066_v47  ;;  %v2609_v47 = vrot.slane %v5839_v59, %v540_v17 }
 0x88d   : > { %3744 = vmatpush2.bf16.msra.mxu1 %v5064_v48 }
 0x88e   : > { %3745 = vmatprep.subr.bf16.mxu1 %v5072_v49  ;;  %v5120_v49 = vld [vmem:[%s5311_s13 + $0x294] ss:$8 sps:$4 sm:$0xff]  }
 0x891   : > { %3746 = vmatpush2.bf16.msra.mxu1 %v5070_v50 }
 0x892   : > { %3747 = vmatprep.subr.bf16.mxu1 %v5078_v51 }
 0x895   : > { %3748 = vmatpush2.bf16.msra.mxu1 %v5076_v52  ;;  %v5118_v52 = vld [vmem:[%s5311_s13 + $0x290] ss:$8 sps:$4 sm:$0xff]  }
 0x896   : > { %3749 = vmatprep.subr.bf16.mxu1 %v5084_v53 }
 0x899   : > { %3750 = vmatpush2.bf16.msra.mxu1 %v5082_v54 }
 0x8ec   : > { %v3020_v4 = vpop.f32.mrf.mxu1  ;;  %v3061_v5 = vpop.f32.mrf.mxu0 }
 0x8ed   : > { %v3021_v6 = vadd.f32 %v3020_v4, %v2593_v61  ;;  %v3062_v8 = vadd.f32 %v3061_v5, %v2601_v62 }
 0x8ee   : > { %v3022_v10 = vpop.f32.mrf.mxu1  ;;  %v3063_v11 = vpop.f32.mrf.mxu0 }
 0x8ef   : > { %v3023_v60 = vadd.f32 %v3022_v10, %v2597_v63  ;;  %v3064_v12 = vadd.f32 %v3063_v11, %v2605_v2  ;;  %v3109_v13 = vmax.f32 %v3021_v6, 0.0  ;;  %v3111_v14 = vmax.f32 %v3062_v8, 0.0  ;;  %v4554_v11 = vld [vmem:[%s5291_s17 + $0x41] ss:$8 sm:$0x3] }
 0x8f0   : > { %v3024_v30 = vpop.f32.mrf.mxu1  ;;  %v3065_v15 = vpop.f32.mrf.mxu0 }
 0x8f1   : > { %v3110_v16 = vmax.f32 %v3023_v60, 0.0  ;;  %v3112_v21 = vmax.f32 %v3064_v12, 0.0  ;;  %v3115_v29 = vpack.c.bf16 %v3109_v13, %v3109_v13  ;;  %v3117_v3 = vpack.c.bf16 %v3111_v14, %v3111_v14 }
 0x8f2   : > { %v3025_v0 = vpop.f32.mrf.mxu1  ;;  %v3066_v24 = vpop.f32.mrf.mxu0  ;;  %v3217_v60 = vrot.slane %v4554_v11, %v5459_v26  ;;  %v3221_v12 = vrot.slane %v4554_v11, %v5453_v23 }
 0x8f3   : > { %v3116_v22 = vpack.c.bf16 %v3110_v16, %v3110_v16  ;;  %v3118_v27 = vpack.c.bf16 %v3112_v21, %v3112_v21 }
 0x8f5   : > { %3710 = vmatprep.mubr.bf16.mxu0 %v3116_v22  ;;  %3751 = vmatprep.mubr.bf16.mxu1 %v3118_v27 }
 0x8f6   : > { %3711 = vmatmul.mubr.bf16.vlgmr.msra.gmra.mxu0 %v3115_v29  ;;  %3752 = vmatmul.mubr.bf16.vlgmr.msra.gmra.mxu1 %v3117_v3 }
 0x8f7   : > { %3761 = vmatpush1.bf16.msra.mxu0 %v5085_v28 }
 0x8f8   : > { %3762 = vmatprep.subr.bf16.mxu0 %v5090_v1 }
 0x8fb   : > { %3763 = vmatpush1.bf16.msra.mxu0 %v5088_v33 }
 0x8fc   : > { %3764 = vmatprep.subr.bf16.mxu0 %v5093_v34 }
 0x8ff   : > { %3765 = vmatpush1.bf16.msra.mxu0 %v5091_v35 }
 0x900   : > { %3766 = vmatprep.subr.bf16.mxu0 %v5096_v36 }
 0x903   : > { %3767 = vmatpush1.bf16.msra.mxu0 %v5094_v37 }
 0x904   : > { %3768 = vmatprep.subr.bf16.mxu0 %v5099_v38 }
 0x907   : > { %3769 = vmatpush1.bf16.msra.mxu0 %v5097_v32 }
 0x908   : > { %3770 = vmatprep.subr.bf16.mxu0 %v5102_v7 }
 0x90b   : > { %3771 = vmatpush1.bf16.msra.mxu0 %v5100_v25 }
 0x90c   : > { %3772 = vmatprep.subr.bf16.mxu0 %v5105_v39  ;;  %v4646_v39 = vld [vmem:[%s5291_s17 + $0x42] ss:$8 sm:$0x3] }
 0x90f   : > { %3773 = vmatpush1.bf16.msra.mxu0 %v5103_v40  ;;  %v4647_v40 = vld [vmem:[%s5291_s17 + $0x43] ss:$8 sm:$0x3] }
 0x910   : > { %3774 = vmatprep.subr.bf16.mxu0 %v5108_v41  ;;  %v3829_v41 = vrot.slane %v4646_v39, %v5459_v26 }
 0x913   : > { %3775 = vmatpush1.bf16.msra.mxu0 %v5106_v18  ;;  %v3833_v18 = vrot.slane %v4646_v39, %v5453_v23 }
 0x914   : > { %3782 = vmatprep.subr.bf16.mxu0 %v5111_v31 }
 0x917   : > { %3783 = vmatpush2.bf16.msra.mxu0 %v5109_v42  ;;  %v3842_v42 = vrot.slane %v4647_v40, %v5459_v26 }
 0x918   : > { %3784 = vmatprep.subr.bf16.mxu0 %v5114_v55  ;;  %v3846_v55 = vrot.slane %v4647_v40, %v5453_v23 }
 0x91b   : > { %3785 = vmatpush2.bf16.msra.mxu0 %v5112_v43 }
 0x91c   : > { %v3102_v48 = vpop.f32.mrf.mxu1  ;;  %3786 = vmatprep.subr.bf16.mxu0 %v5117_v44 }
 0x91d   : > { %v3103_v53 = vadd.f32 %v3102_v48, %v2609_v47 }
 0x91e   : > { %v3104_v50 = vpop.f32.mrf.mxu1 }
 0x91f   : > { %v3105_v51 = vadd.f32 %v3104_v50, %v2613_v45  ;;  %3787 = vmatpush2.bf16.msra.mxu0 %v5115_v46  ;;  %v3113_v17 = vmax.f32 %v3103_v53, 0.0 }
 0x920   : > { %v3106_v54 = vpop.f32.mrf.mxu1  ;;  %3788 = vmatprep.subr.bf16.mxu0 %v5120_v49 }
 0x921   : > { %v3114_v58 = vmax.f32 %v3105_v51, 0.0  ;;  %v3119_v59 = vpack.c.bf16 %v3113_v17, %v3113_v17 }
 0x922   : > { %v3107_v61 = vpop.f32.mrf.mxu1 }
 0x923   : > { %v3120_v9 = vpack.c.bf16 %v3114_v58, %v3114_v58  ;;  %3789 = vmatpush2.bf16.msra.mxu0 %v5118_v52 }
 0x924   : > { %3790 = vmatprep.subr.bf16.mxu0 %v5123_v56 }
 0x925   : > { %4645 = vmatprep.mubr.msk.bf16.mxu0 %vm3674_vm8, %v3120_v9 }
 0x927   : > { %3791 = vmatpush2.bf16.msra.mxu0 %v5121_v20 }
 0x92a   : > { %3793 = vmatmul.mubr.bf16.vlgmr.msra.gmra.mxu0 %v3119_v59 }
 0x9b6   : > { %v3712_v62 = vpop.f32.mrf.mxu0  ;;  %v3753_v63 = vpop.f32.mrf.mxu1 }
 0x9b7   : > { %v3713_v13 = vadd.f32 %v3712_v62, %v3217_v60 }
 0x9b8   : > { %v3714_v2 = vpop.f32.mrf.mxu0  ;;  %v3755_v4 = vpop.f32.mrf.mxu1 }
 0x9b9   : > { %v3715_v14 = vadd.f32 %v3714_v2, %v3221_v12  ;;  %v3754_v30 = vadd.f32 %v3753_v63, %v3713_v13 }
 0x9ba   : > { %v3716_v5 = vpop.f32.mrf.mxu0  ;;  %v3757_v6 = vpop.f32.mrf.mxu1 }
 0x9bb   : > { %v3756_v16 = vadd.f32 %v3755_v4, %v3715_v14 }
 0x9bc   : > { %v3717_v8 = vpop.f32.mrf.mxu0  ;;  %v3758_v10 = vpop.f32.mrf.mxu1 }
 0x9ea   : > { %v3794_v15 = vpop.f32.mrf.mxu0 }
 0x9eb   : > { %v3795_v21 = vadd.f32 %v3794_v15, %v3754_v30 }
 0x9ec   : > { %v3796_v0 = vpop.f32.mrf.mxu0 }
 0x9ed   : > { %v3797_v24 = vadd.f32 %v3796_v0, %v3756_v16  ;;  %v3801_v28 = vadd.f32 %v3795_v21, %v5735_v19 }
 0x9ee   : > { %v3798_v22 = vpop.f32.mrf.mxu0 }
 0x9ef   : > { %v3802_v27 = vadd.f32 %v3797_v24, %v5733_v57 }
 0x9f0   : > { %v3799_v29 = vpop.f32.mrf.mxu0 }
 0x9f1   : > { %v3807_v3 = vsel %vm1022_vm3, %v3802_v27, 0.0 }
 0x9f2   : > { %v3808_v1 = vadd.f32 %v3807_v3, %v3801_v28 }
 0x9f4   : > { %3809 = vadd.xlane.f32.xlu0 %v3808_v1 }
 0xa7d   : > { %v3810_v33 = vpop.xlane.xlu0 %3809 }
 0xa7e   : > { %v3811_v34 = vmul.f32 0.0055555557, %v3810_v33 }
 0xa80   : > { %v3812_v35 = vsub.f32 %v3801_v28, %v3811_v34  ;;  %v3813_v36 = vsub.f32 %v3802_v27, %v3811_v34 }
 0xa82   : > { %v3815_v37 = vmul.f32 %v3813_v36, %v3813_v36  ;;  %v3814_v38 = vmul.f32 %v3812_v35, %v3812_v35 }
 0xa84   : > { %v3816_v32 = vsel %vm1022_vm3, %v3815_v37, 0.0 }
 0xa85   : > { %v3817_v7 = vadd.f32 %v3816_v32, %v3814_v38 }
 0xa87   : > { %3818 = vadd.xlane.f32.xlu1 %v3817_v7 }
 0xb10   : > { %v3819_v57 = vpop.xlane.xlu1 %3818 }
 0xb11   : > { %v3820_v25 = vmul.f32 0.0055555557, %v3819_v57 }
 0xb13   : > { %v3821_v19 = vadd.f32 1e-05, %v3820_v25 }
 0xb15   : > { %5142 = vrsqrt.f32 %v3821_v19 }
 0xb22   : > { %v5143_v31 = vpop.eup %5142 }
 0xb23   : > { %v3823_v43 = vmul.f32 %v5143_v31, %v3812_v35  ;;  %v3824_v44 = vmul.f32 %v5143_v31, %v3813_v36 }
 0xb25   : > { %v3836_v45 = vmul.f32 %v3829_v41, %v3823_v43  ;;  %v3837_v46 = vmul.f32 %v3833_v18, %v3824_v44  ;;  %3856 = sbr.rel (%p4648_p5) target bundleno = 3130 (0xc3a), region = 64 }
 0xb27   : > { %v5895_v47 = vadd.f32 %v3842_v42, %v3836_v45  ;;  %v5897_v48 = vadd.f32 %v3846_v55, %v3837_v46 }
 0xb29   : > { %3851 = vst [vmem:[#allocation2] sm:$0xff] %v5895_v47  ;;  %3852 = vst.msk [vmem:[#allocation2 + $0x8] sm:$0xff] %vm1022_vm3, %v5897_v48 }
 0xb2a   : > { %v5146_v49 = vld [vmem:[%s6009_s7 + $0x74] ss:$8 sps:$4 sm:$0xff]   ;;  %v3858_v50 = vpack.c.bf16 %v5897_v48, %v5897_v48  ;;  %v5148_v51 = vld [vmem:[%s6009_s7 + $0x70] ss:$8 sps:$4 sm:$0xff]   ;;  %v5149_v52 = vld [vmem:[%s6009_s7 + $0x64] ss:$8 sps:$4 sm:$0xff]   ;;  %v3857_v15 = vpack.c.bf16 %v5895_v47, %v5895_v47 }
 0xb2b   : > { %4018 = vmatprep.subr.bf16.mxu0 %v5146_v49  ;;  %v5151_v53 = vld [vmem:[%s6009_s7 + $0x60] ss:$8 sps:$4 sm:$0xff]   ;;  %v5152_v54 = vld [vmem:[%s6009_s7 + $0x54] ss:$8 sps:$4 sm:$0xff]   ;;  %v5154_v56 = vld [vmem:[%s6009_s7 + $0x50] ss:$8 sps:$4 sm:$0xff]  }
 0xb2c   : > { %4674 = vmatprep.mubr.msk.bf16.mxu0 %vm1022_vm3, %v3858_v50  ;;  %4019 = vmatpush1.bf16.msra.mxu0 %v5148_v51  ;;  %v5155_v58 = vld [vmem:[%s6009_s7 + $0x44] ss:$8 sps:$4 sm:$0xff]   ;;  %v5157_v61 = vld [vmem:[%s6009_s7 + $0x40] ss:$8 sps:$4 sm:$0xff]   ;;  %v5158_v9 = vld [vmem:[%s6009_s7 + $0x34] ss:$8 sps:$4 sm:$0xff]  }
 0xb2d   : > { %4020 = vmatprep.subr.bf16.mxu0 %v5149_v52  ;;  %v5160_v20 = vld [vmem:[%s6009_s7 + $0x30] ss:$8 sps:$4 sm:$0xff]   ;;  %v5161_v17 = vld [vmem:[%s6009_s7 + $0x24] ss:$8 sps:$4 sm:$0xff]   ;;  %v5163_v59 = vld [vmem:[%s6009_s7 + $0x20] ss:$8 sps:$4 sm:$0xff]  }
 0xb2e   : > { %v5164_v62 = vld [vmem:[%s6009_s7 + $0x14] ss:$8 sps:$4 sm:$0xff]   ;;  %v5166_v63 = vld [vmem:[%s6009_s7 + $0x10] ss:$8 sps:$4 sm:$0xff]   ;;  %v5167_v2 = vld [vmem:[%s6009_s7 + $0x4] ss:$8 sps:$4 sm:$0xff]  }
 0xb2f   : > { %v3881_v4 = vld [vmem:[%s6009_s7 + $0xb0] sm:$0x33]  ;;  %v5169_v5 = vld [vmem:[%s6009_s7] ss:$8 sps:$4 sm:$0xff]   ;;  %v5172_v11 = vld [vmem:[%s6009_s7 + $0xa4] ss:$8 sps:$4 sm:$0xff]  }
 0xb30   : > { %4021 = vmatpush1.bf16.msra.mxu0 %v5151_v53  ;;  %v4672_v6 = vcombine.high %v3881_v4, %v3881_v4  ;;  %v4671_v8 = vcombine.low %v3881_v4, %v3881_v4  ;;  %v5174_v60 = vld [vmem:[%s6009_s7 + $0xa0] ss:$8 sps:$4 sm:$0xff]   ;;  %v5175_v12 = vld [vmem:[%s6009_s7 + $0x94] ss:$8 sps:$4 sm:$0xff]   ;;  %v5177_v13 = vld [vmem:[%s6009_s7 + $0x90] ss:$8 sps:$4 sm:$0xff]  }
 0xb31   : > { %4022 = vmatprep.subr.bf16.mxu0 %v5152_v54  ;;  %v5178_v14 = vld [vmem:[%s6009_s7 + $0x84] ss:$8 sps:$4 sm:$0xff]   ;;  %v5180_v30 = vld [vmem:[%s6009_s7 + $0x80] ss:$8 sps:$4 sm:$0xff]  }
 0xb32   : > { %v4013_v10 = vsel %vm1026_vm4, %v4671_v8, 0  ;;  %v3882_v16 = vld [vmem:[%s6010_s8] sm:$0x3] }
 0xb33   : > { %v3887_v21 = vrot.slane %v3882_v16, %v5459_v26  ;;  %v3891_v0 = vrot.slane %v3882_v16, %v5453_v23 }
 0xb34   : > { %4023 = vmatpush1.bf16.msra.mxu0 %v5154_v56 }
 0xb35   : > { %4024 = vmatprep.subr.bf16.mxu0 %v5155_v58 }
 0xb38   : > { %4025 = vmatpush1.bf16.msra.mxu0 %v5157_v61 }
 0xb39   : > { %4026 = vmatprep.subr.bf16.mxu0 %v5158_v9 }
 0xb3c   : > { %4027 = vmatpush1.bf16.msra.mxu0 %v5160_v20 }
 0xb3d   : > { %4028 = vmatprep.subr.bf16.mxu0 %v5161_v17 }
 0xb40   : > { %4029 = vmatpush1.bf16.msra.mxu0 %v5163_v59 }
 0xb41   : > { %4030 = vmatprep.subr.bf16.mxu0 %v5164_v62 }
 0xb44   : > { %4031 = vmatpush1.bf16.msra.mxu0 %v5166_v63 }
 0xb45   : > { %4032 = vmatprep.subr.bf16.mxu0 %v5167_v2 }
 0xb48   : > { %4033 = vmatpush1.bf16.msra.mxu0 %v5169_v5 }
 0xb49   : > { %4673 = vmatprep.subr.msk.bf16.mxu0 %vm1026_vm4, %v4672_v6 }
 0xb4c   : > { %4043 = vmatpush2.bf16.msra.mxu0 %v4013_v10 }
 0xb4d   : > { %4044 = vmatprep.subr.bf16.mxu0 %v5172_v11 }
 0xb50   : > { %4045 = vmatpush2.bf16.msra.mxu0 %v5174_v60 }
 0xb51   : > { %4046 = vmatprep.subr.bf16.mxu0 %v5175_v12 }
 0xb54   : > { %4047 = vmatpush2.bf16.msra.mxu0 %v5177_v13 }
 0xb55   : > { %4048 = vmatprep.subr.bf16.mxu0 %v5178_v14 }
 0xb58   : > { %4049 = vmatpush2.bf16.msra.mxu0 %v5180_v30 }
 0xb5b   : > { %4051 = vmatmul.mubr.bf16.vlgmr.msra.gmra.mxu0 %v3857_v15 }
 0xc1b   : > { %v4052_v24 = vpop.f32.mrf.mxu0 }
 0xc1c   : > { %v4053_v22 = vadd.f32 %v4052_v24, %v3887_v21 }
 0xc1d   : > { %v4054_v27 = vpop.f32.mrf.mxu0 }
 0xc1e   : > { %v4061_v28 = vmul.f32 1.442695, %v4053_v22  ;;  %v4055_v29 = vadd.f32 %v4054_v27, %v3891_v0  ;;  %vm4059_vm9 = vcmp.gt.f32.partialorder %v4053_v22, 0.0 }
 0xc1f   : > { %v4056_v3 = vpop.f32.mrf.mxu0 }
 0xc20   : > { %5181 = vpow2.f32 %v4061_v28  ;;  %v4063_v1 = vmul.f32 1.442695, %v4055_v29  ;;  %vm4060_vm10 = vcmp.gt.f32.partialorder %v4055_v29, 0.0 }
 0xc21   : > { %v4057_v33 = vpop.f32.mrf.mxu0 }
 0xc22   : > { %5183 = vpow2.f32 %v4063_v1 }
 0xc2d   : > { %v5182_v34 = vpop.eup %5181 }
 0xc2e   : > { %v4675_v35 = vadd.f32 -1.0, %v5182_v34 }
 0xc2f   : > { %v5184_v36 = vpop.eup %5183 }
 0xc30   : > { %v4067_v37 = vmul.f32 1.6732632, %v4675_v35  ;;  %v4676_v38 = vadd.f32 -1.0, %v5184_v36 }
 0xc32   : > { %v4069_v32 = vsel %vm4059_vm9, %v4053_v22, %v4067_v37  ;;  %v4068_v26 = vmul.f32 1.6732632, %v4676_v38 }
 0xc33   : > { %v4071_v7 = vmul.f32 1.050701, %v4069_v32 }
 0xc34   : > { %v4070_v23 = vsel %vm4060_vm10, %v4055_v29, %v4068_v26 }
 0xc35   : > { %v4073_v57 = vadd.f32 %v4071_v7, %v5895_v47  ;;  %v4072_v25 = vmul.f32 1.050701, %v4070_v23 }
 0xc37   : > { %4075 = vst [vmem:[#allocation4] sm:$0xff] %v4073_v57  ;;  %v4074_v19 = vadd.f32 %v4072_v25, %v5897_v48 }
 0xc39   : > { %4076 = vst.msk [vmem:[#allocation4 + $0x8] sm:$0xff] %vm1022_vm3, %v4074_v19 }
 0xc3a PF: > { %p4721_p6 = scmp.eq.s32.totalorder %s5282_s10, 1  ;;  %s5225_s13 = smov [#allocation4]  }
 0xc3b   : > { %s4084_s15 = sshll.u32 %s5225_s13, 4  ;;  %s4085_s15 = int_to_ptr.vmem [resolvable:$true] %s4084_s15 }
 0xc3c   : > { %s5185_s16 = scalar_lea.vmem %s4085_s15, 256  ;;  %p5192_p10 = scmp.lt.s32.totalorder %s4085_s15, %s4085_s15 }
 0xc3d   : > { %p5186_p7 = scmp.ne.s32.totalorder %s4085_s15, %s5185_s16  ;;  %p5193_p11 = scmp.lt.s32.totalorder %s5185_s16, %s5185_s16 }
 0xc3f   : > { %p5187_p8 = pnand %p5186_p7, %p4721_p6  ;;  %p5194_p12 = por %p5193_p11, %p5192_p10 }
 0xc41   : > { %p5188_p9 = pneg %p5187_p8 }
 0xc43   : > { %p5195_p13 = pnand %p5194_p12, %p5188_p9 }
 0xc45   : > { %5198 = shalt.err (!%p5195_p13)
}
 0xc46   : > { %4718 = dma.vmem_to_hbm [thread:$0]  (%p4721_p6), %s4085_s15, 256, %s6011_s9, [#allocation5]  }
 0xc47   : > { %5214 = dma.done.wait (%p4721_p6), [#allocation5], 256  }
 0xc48   : > { %5216 = vsyncadd (%p4721_p6), [#allocation5], 4294967040 }
 0xc49 PF: > { %s20_s30 = sadd.s32 1, %s5219_s30  }
 0xc4a   : > { %p17_p0 = scmp.ge.s32.totalorder %s20_s30, 4  }
 0xc4c   :  { %19 = sbr.rel (!%p17_p0) target bundleno = 1 (0x1), region = 117 }
 0xc51   :  { %4097 = vsyncpa [#allocation5], 1 }
 0xc52   :  { %4099 = vsyncpa [#allocation5 + $0x1], 1 }

</bundles_post_ra>
